<compile_context>
chip_gen: v7x
topology: tpu7x:2x2x1
jax: 0.10.0
libtpu: 0.0.40
codegen_flags: <defaults>
</compile_context>

<pallas_src>
import functools
import math

import jax
import jax.numpy as jnp
from jax.experimental import pallas as pl
from jax.experimental.pallas import tpu as pltpu

LANE = 128


def _round_up(x, m):
    return (x + m - 1) // m * m


# ================================ Pallas kernel ================================

def _attention_kernel(x_ref, wqkv_ref, wout_ref, bout_ref, o_ref, *,
                      heads_p, dim_head):
    """Fused attention forward for one batch element (grid axis = batch).

    x_ref    : (1, N, Dp_in)        f32, feature dim zero-padded to 128 lanes
    wqkv_ref : (Dp_in, 3*inner_p)   bf16, [q|0][k|0][v|0] columns, every segment
                                    128-lane aligned, q weights pre-scaled
    wout_ref : (inner_p, Dp_out)    bf16, zero rows for padded heads
    bout_ref : (1, Dp_out)          f32
    o_ref    : (1, N, Dp_out)       f32, lane-dense output
    """
    N = x_ref.shape[1]
    inner_p = heads_p * dim_head

    # qkv projection: bf16 MXU operands, f32 accumulate.
    x2d = x_ref[0].astype(jnp.bfloat16)                          # (N, Dp_in)
    qkv = jnp.dot(x2d, wqkv_ref[...],
                  preferred_element_type=jnp.float32)            # (N, 3*inner_p)

    # 128-lane aligned q/k/v slabs -> (N, heads_p, dim_head).  Padded heads are
    # all-zero and contribute nothing (their wout rows are zero as well).
    q = qkv[:, 0:inner_p].reshape(N, heads_p, dim_head)
    k = qkv[:, inner_p:2 * inner_p].reshape(N, heads_p, dim_head)
    v = qkv[:, 2 * inner_p:3 * inner_p].reshape(N, heads_p, dim_head)

    # Scores, batched over heads (softmax scale already folded into q weights).
    s = jnp.einsum('qhd,khd->hqk',
                   q.astype(jnp.bfloat16), k.astype(jnp.bfloat16),
                   preferred_element_type=jnp.float32)           # (heads_p, N, N)

    # Softmax in f32 on the VPU; denominator reciprocal on the EUP.
    s = s - jnp.max(s, axis=-1, keepdims=True)
    p = jnp.exp(s)
    p = p * pl.reciprocal(jnp.sum(p, axis=-1, keepdims=True), approx=True)
    # TODO(synk): for large-N pyramid stages (196-3136 tokens) replace this dense
    # (heads, N, N) score tensor with a KV-tiled online-softmax loop (v7x VMEM).

    # Attention-weighted values, laid out head-contiguous for one big matmul.
    o = jnp.einsum('hqk,khd->qhd',
                   p.astype(jnp.bfloat16), v.astype(jnp.bfloat16),
                   preferred_element_type=jnp.float32)           # (N, heads_p, dh)

    out = jnp.dot(o.reshape(N, inner_p).astype(jnp.bfloat16), wout_ref[...],
                  preferred_element_type=jnp.float32)            # (N, Dp_out)
    o_ref[0] = out + bout_ref[...]


# ============================ one-time weight prep ============================

def prepare_attention_weights(w_qkv, w_out, b_out, *, dim, heads, dim_head):
    """Transpose / pad / bf16-cast PyTorch-layout weights once (hoisted out of
    the forward path).  Also folds the softmax scale into the q projection."""
    inner = heads * dim_head
    D = dim
    assert w_qkv.shape == (3 * inner, D)
    assert w_out.shape == (D, inner)
    assert b_out.shape == (D,)
    # TODO(synk): heads==1 and dim_head==dim (to_out = nn.Identity) path not implemented.

    Dp_in = _round_up(D, LANE)
    Dp_out = _round_up(D, LANE)
    inner_p = _round_up(inner, LANE)
    assert inner_p % dim_head == 0, "dim_head must divide the 128-padded inner dim"

    scale = dim_head ** -0.5
    wq, wk, wv = jnp.split(w_qkv.astype(jnp.float32), 3, axis=0)   # (inner, D) each
    wq = wq * scale                                # fold softmax scale into q weights

    def seg(w):                                    # (inner, D) -> (Dp_in, inner_p)
        return jnp.pad(w.T, ((0, Dp_in - D), (0, inner_p - inner)))

    wqkv_p = jnp.concatenate([seg(wq), seg(wk), seg(wv)],
                             axis=1).astype(jnp.bfloat16)          # (Dp_in, 3*inner_p)
    wout_p = jnp.pad(w_out.T.astype(jnp.float32),
                     ((0, inner_p - inner), (0, Dp_out - D))
                     ).astype(jnp.bfloat16)                        # (inner_p, Dp_out)
    bout_p = jnp.pad(b_out.astype(jnp.float32),
                     (0, Dp_out - D)).reshape(1, Dp_out)           # (1, Dp_out)
    return wqkv_p, wout_p, bout_p


# ================================== forward ===================================

def attention_forward(x, wqkv_p, wout_p, bout_p, *, dim_head):
    """Attention.forward(x) with pre-prepared weights.  Dropout(p=0.0) is a no-op."""
    B, N, D = x.shape
    Dp_in = wqkv_p.shape[0]
    inner_p, Dp_out = wout_p.shape
    heads_p = inner_p // dim_head

    # Lane-dense padding of the activation feature dim.
    xp = jnp.pad(x.astype(jnp.float32), ((0, 0), (0, 0), (0, Dp_in - D)))

    out = pl.pallas_call(
        functools.partial(_attention_kernel, heads_p=heads_p, dim_head=dim_head),
        out_shape=jax.ShapeDtypeStruct((B, N, Dp_out), jnp.float32),
        grid_spec=pltpu.PrefetchScalarGridSpec(
            num_scalar_prefetch=0,
            grid=(B,),
            in_specs=[
                pl.BlockSpec((1, N, Dp_in), lambda b: (b, 0, 0)),
                pl.BlockSpec((Dp_in, 3 * inner_p), lambda b: (0, 0)),   # resident
                pl.BlockSpec((inner_p, Dp_out), lambda b: (0, 0)),      # resident
                pl.BlockSpec((1, Dp_out), lambda b: (0, 0)),            # resident
            ],
            out_specs=pl.BlockSpec((1, N, Dp_out), lambda b: (b, 0, 0)),
        ),
        compiler_params=pltpu.CompilerParams(
            # Batch axis shards across v7x's 2 TensorCores; double-buffers on v5e/v6e.
            dimension_semantics=("parallel",),
            # Sized against the smallest generation (v7x: 64 MiB physical VMEM).
            vmem_limit_bytes=48 * 1024 * 1024,
        ),
    )(xp, wqkv_p, wout_p, bout_p)

    return out[:, :, :D]


# ============================ pure-JAX reference ==============================

def attention_reference(x, w_qkv, w_out, b_out, *, heads, dim_head):
    B, N, D = x.shape
    inner = heads * dim_head
    qkv = jnp.einsum('bnd,ed->bne', x, w_qkv)                 # x @ Wqkv^T
    q, k, v = jnp.split(qkv, 3, axis=-1)

    def to_heads(t):
        return t.reshape(B, N, heads, dim_head).transpose(0, 2, 1, 3)

    q, k, v = map(to_heads, (q, k, v))
    s = jnp.einsum('bhqd,bhkd->bhqk', q, k) * (dim_head ** -0.5)
    p = jax.nn.softmax(s, axis=-1)
    o = jnp.einsum('bhqk,bhkd->bhqd', p, v)
    o = o.transpose(0, 2, 1, 3).reshape(B, N, inner)
    return jnp.einsum('bni,oi->bno', o, w_out) + b_out


# ==================================== main ====================================

if __name__ == "__main__":
    B, N, DIM, HEADS, DIM_HEAD = 2, 16, 64, 4, 16
    INNER = HEADS * DIM_HEAD

    key = jax.random.PRNGKey(0)
    kx, kqkv, kout, kb = jax.random.split(key, 4)
    x = jax.random.normal(kx, (B, N, DIM), jnp.float32)
    w_qkv = jax.random.normal(kqkv, (3 * INNER, DIM), jnp.float32) / math.sqrt(DIM)
    w_out = jax.random.normal(kout, (DIM, INNER), jnp.float32) / math.sqrt(INNER)
    b_out = 0.1 * jax.random.normal(kb, (DIM,), jnp.float32)

    # One-time weight prep (transpose / pad / bf16 cast / scale fold).
    wqkv_p, wout_p, bout_p = prepare_attention_weights(
        w_qkv, w_out, b_out, dim=DIM, heads=HEADS, dim_head=DIM_HEAD)

    fwd = jax.jit(functools.partial(attention_forward, dim_head=DIM_HEAD))
    out = fwd(x, wqkv_p, wout_p, bout_p)
    jax.block_until_ready(out)

    ref = attention_reference(x, w_qkv, w_out, b_out, heads=HEADS, dim_head=DIM_HEAD)
    assert out.shape == (B, N, DIM), out.shape
    assert bool(jnp.all(jnp.isfinite(out)))
    # Tolerance covers bf16 MXU operands + approximate-reciprocal softmax.
    err = float(jnp.max(jnp.abs(out - ref)))
    assert err < 5e-2, err
    print("KERNEL_OK")
</pallas_src>

<mosaic_0001>
module attributes {stable_mosaic.version = 11 : i64} {
  func.func @_attention_kernel(%arg0: i32, %arg1: memref<1x16x128xf32, #tpu.memory_space<vmem>>, %arg2: memref<128x384xbf16, #tpu.memory_space<vmem>>, %arg3: memref<128x128xbf16, #tpu.memory_space<vmem>>, %arg4: memref<1x128xf32, #tpu.memory_space<vmem>>, %arg5: memref<1x16x128xf32, #tpu.memory_space<vmem>>) attributes {dimension_semantics = [#tpu.dimension_semantics<parallel>], iteration_bounds = array<i64: 2>, scalar_prefetch = 0 : i64, scratch_operands = 0 : i64, tpu.core_type = #tpu.core_type<tc>, window_params = [{transform_indices = @transform_0, window_bounds = array<i64: 1, 16, 128>}, {pipeline_mode = #tpu.pipeline_mode<synchronous>, transform_indices = @transform_1, window_bounds = array<i64: 128, 384>}, {pipeline_mode = #tpu.pipeline_mode<synchronous>, transform_indices = @transform_2, window_bounds = array<i64: 128, 128>}, {pipeline_mode = #tpu.pipeline_mode<synchronous>, transform_indices = @transform_3, window_bounds = array<i64: 1, 128>}, {transform_indices = @transform_4, window_bounds = array<i64: 1, 16, 128>}]} {
    %c0 = arith.constant 0 : index
    %c0_0 = arith.constant 0 : index
    %c0_1 = arith.constant 0 : index
    %0 = vector.load %arg1[%c0, %c0_0, %c0_1] : memref<1x16x128xf32, #tpu.memory_space<vmem>>, vector<1x16x128xf32>
    %1 = vector.shape_cast %0 : vector<1x16x128xf32> to vector<16x128xf32>
    %2 = arith.truncf %1 : vector<16x128xf32> to vector<16x128xbf16>
    %c0_2 = arith.constant 0 : index
    %c0_3 = arith.constant 0 : index
    %3 = vector.load %arg2[%c0_2, %c0_3] : memref<128x384xbf16, #tpu.memory_space<vmem>>, vector<128x384xbf16>
    %cst = arith.constant dense<0.000000e+00> : vector<16x384xf32>
    %4 = tpu.matmul %2, %3, %cst {dimension_numbers = #tpu.dot_dimension_numbers<[1], [0], [0], [1], [0, 0, 1, 1], [], []>} : vector<16x128xbf16>, vector<128x384xbf16>, vector<16x384xf32> -> vector<16x384xf32>
    %5 = vector.extract_strided_slice %4 {offsets = [0, 0], sizes = [16, 128], strides = [1, 1]} : vector<16x384xf32> to vector<16x128xf32>
    %6 = vector.shape_cast %5 : vector<16x128xf32> to vector<16x8x16xf32>
    %7 = vector.extract_strided_slice %4 {offsets = [0, 128], sizes = [16, 128], strides = [1, 1]} : vector<16x384xf32> to vector<16x128xf32>
    %8 = vector.shape_cast %7 : vector<16x128xf32> to vector<16x8x16xf32>
    %9 = vector.extract_strided_slice %4 {offsets = [0, 256], sizes = [16, 128], strides = [1, 1]} : vector<16x384xf32> to vector<16x128xf32>
    %10 = vector.shape_cast %9 : vector<16x128xf32> to vector<16x8x16xf32>
    %11 = arith.truncf %6 : vector<16x8x16xf32> to vector<16x8x16xbf16>
    %12 = arith.truncf %8 : vector<16x8x16xf32> to vector<16x8x16xbf16>
    "tpu.trace_start"() <{level = 10 : i32, message = "qhd,khd->hqk"}> : () -> ()
    %cst_4 = arith.constant dense<0.000000e+00> : vector<8x16x16xf32>
    %13 = tpu.matmul %11, %12, %cst_4 {dimension_numbers = #tpu.dot_dimension_numbers<[2], [2], [0], [0], [0, 1, 0, 0, 1, 0], [1], [1]>} : vector<16x8x16xbf16>, vector<16x8x16xbf16>, vector<8x16x16xf32> -> vector<8x16x16xf32>
    "tpu.trace_stop"() : () -> ()
    %cst_5 = arith.constant dense<0xFF800000> : vector<8x16xf32>
    %14 = vector.multi_reduction <maximumf>, %13, %cst_5 [2] : vector<8x16x16xf32> to vector<8x16xf32>
    %15 = vector.shape_cast %14 : vector<8x16xf32> to vector<8x16x1xf32>
    %16 = vector.broadcast %15 : vector<8x16x1xf32> to vector<8x16x16xf32>
    %17 = arith.subf %13, %16 : vector<8x16x16xf32>
    %18 = math.exp %17 : vector<8x16x16xf32>
    %cst_6 = arith.constant dense<0.000000e+00> : vector<8x16xf32>
    %19 = vector.multi_reduction <add>, %18, %cst_6 [2] : vector<8x16x16xf32> to vector<8x16xf32>
    %20 = vector.shape_cast %19 : vector<8x16xf32> to vector<8x16x1xf32>
    %21 = tpu.reciprocal %20 {approx = true} : vector<8x16x1xf32> -> vector<8x16x1xf32>
    %22 = vector.broadcast %21 : vector<8x16x1xf32> to vector<8x16x16xf32>
    %23 = arith.mulf %18, %22 : vector<8x16x16xf32>
    %24 = arith.truncf %23 : vector<8x16x16xf32> to vector<8x16x16xbf16>
    %25 = arith.truncf %10 : vector<16x8x16xf32> to vector<16x8x16xbf16>
    "tpu.trace_start"() <{level = 10 : i32, message = "hqk,khd->qhd"}> : () -> ()
    %cst_7 = arith.constant dense<0.000000e+00> : vector<8x16x16xf32>
    %26 = tpu.matmul %25, %24, %cst_7 {dimension_numbers = #tpu.dot_dimension_numbers<[0], [2], [2], [1], [0, 1, 0, 2, 1, 1], [1], [0]>} : vector<16x8x16xbf16>, vector<8x16x16xbf16>, vector<8x16x16xf32> -> vector<8x16x16xf32>
    %27 = tpu.transpose %26, [2, 0, 1] : vector<8x16x16xf32> -> vector<16x8x16xf32>
    "tpu.trace_stop"() : () -> ()
    %28 = vector.shape_cast %27 : vector<16x8x16xf32> to vector<16x128xf32>
    %29 = arith.truncf %28 : vector<16x128xf32> to vector<16x128xbf16>
    %c0_8 = arith.constant 0 : index
    %c0_9 = arith.constant 0 : index
    %30 = vector.load %arg3[%c0_8, %c0_9] : memref<128x128xbf16, #tpu.memory_space<vmem>>, vector<128x128xbf16>
    %cst_10 = arith.constant dense<0.000000e+00> : vector<16x128xf32>
    %31 = tpu.matmul %29, %30, %cst_10 {dimension_numbers = #tpu.dot_dimension_numbers<[1], [0], [0], [1], [0, 0, 1, 1], [], []>} : vector<16x128xbf16>, vector<128x128xbf16>, vector<16x128xf32> -> vector<16x128xf32>
    %c0_11 = arith.constant 0 : index
    %c0_12 = arith.constant 0 : index
    %32 = vector.load %arg4[%c0_11, %c0_12] : memref<1x128xf32, #tpu.memory_space<vmem>>, vector<1x128xf32>
    %33 = vector.broadcast %32 : vector<1x128xf32> to vector<16x128xf32>
    %34 = arith.addf %31, %33 : vector<16x128xf32>
    %c0_13 = arith.constant 0 : index
    %c0_14 = arith.constant 0 : index
    %c0_15 = arith.constant 0 : index
    %35 = vector.load %arg5[%c0_13, %c0_14, %c0_15] : memref<1x16x128xf32, #tpu.memory_space<vmem>>, vector<1x16x128xf32>
    %36 = vector.shape_cast %35 : vector<1x16x128xf32> to vector<16x128xf32>
    %37 = vector.shape_cast %34 : vector<16x128xf32> to vector<1x16x128xf32>
    tpu.vector_store %arg5[%c0_13, %c0_14, %c0_15], %37 {strides = array<i32>} : memref<1x16x128xf32, #tpu.memory_space<vmem>>, vector<1x16x128xf32>,
    return
  }
  func.func @transform_0(%arg0: i32) -> (i32, i32, i32) {
    %c0_i32 = arith.constant 0 : i32
    %c0_i32_0 = arith.constant 0 : i32
    %c0_i32_1 = arith.constant 0 : i32
    return %arg0, %c0_i32, %c0_i32_0 : i32, i32, i32
  }
  func.func @transform_1(%arg0: i32) -> (i32, i32) {
    %c0_i32 = arith.constant 0 : i32
    %c0_i32_0 = arith.constant 0 : i32
    %c0_i32_1 = arith.constant 0 : i32
    return %c0_i32, %c0_i32_0 : i32, i32
  }
  func.func @transform_2(%arg0: i32) -> (i32, i32) {
    %c0_i32 = arith.constant 0 : i32
    %c0_i32_0 = arith.constant 0 : i32
    %c0_i32_1 = arith.constant 0 : i32
    return %c0_i32, %c0_i32_0 : i32, i32
  }
  func.func @transform_3(%arg0: i32) -> (i32, i32) {
    %c0_i32 = arith.constant 0 : i32
    %c0_i32_0 = arith.constant 0 : i32
    %c0_i32_1 = arith.constant 0 : i32
    return %c0_i32, %c0_i32_0 : i32, i32
  }
  func.func @transform_4(%arg0: i32) -> (i32, i32, i32) {
    %c0_i32 = arith.constant 0 : i32
    %c0_i32_0 = arith.constant 0 : i32
    %c0_i32_1 = arith.constant 0 : i32
    return %arg0, %c0_i32, %c0_i32_0 : i32, i32, i32
  }
}

</mosaic_0001>

<bundles_post_ra>
// kernel: attention_forward.1
= control target key start
LH: loop header
LB: loop body
LE: loop exit
PB: predicated region body
PF: predicated region fallthrough
CT: control target
= control target key end

     0   :  { %9 = vsyncpa [#allocation3], 0  ;;  %s7470_s0 = inlined_call_operand.vmem [shape: f32[2,16,128], index: 0, kind: input, shape index: {}]   ;;  %s7471_s1 = inlined_call_operand.hbm [shape: bf16[128,384], index: 1, kind: input, shape index: {}]   ;;  %s7472_s2 = inlined_call_operand.vmem [shape: bf16[128,128], index: 2, kind: input, shape index: {}]   ;;  %s7473_s3 = inlined_call_operand.vmem [shape: f32[1,128], index: 3, kind: input, shape index: {}]   ;;  %s7474_s4 = inlined_call_operand.hbm [shape: f32[2,16,128], index: 4, kind: output, shape index: {}]  }
   0x1   :  { %10 = vsyncpa [#allocation4], 0 }
   0x2   :  { %12 = vsyncpa [#allocation4 + $0x1], 0  ;;  %s6250_s15 = smov 0   ;;  %s6252_s16 = smov 0  }
   0x3   :  { %s6254_s17 = smov 0   ;;  %s6256_s18 = smov 0  }
   0x4 LB: > { %s6271_s19 = sadd.s32 4294967295, %s6205_s18   ;;  %s5631_s20 = sadd.s32 4294967294, %s6205_s18   ;;  %s6205_s18 = sphi %s6256_s18, %s7490_s18   ;;  %s6201_s17 = sphi %s6254_s17, %s7489_s17   ;;  %s6197_s16 = sphi %s6252_s16, %s7488_s16   ;;  %s6193_s15 = sphi %s6250_s15, %s7487_s15  }
   0x5   : > { %s6275_s21 = sadd.s32 1, %s6205_s18   ;;  %s114_s22 = sadd.s32 1, %s6201_s17 }
   0x6   : > { %s111_s23 = ssub.s32 %s6205_s18, %s6275_s21  ;;  %p124_p0 = scmp.ne.s32.totalorder %s6201_s17, %s6197_s16 }
   0x7   : > { %p112_p1 = scmp.eq.s32.totalorder %s111_s23, 0  ;;  %p125_p2 = scmp.eq.s32.totalorder %s6271_s19, 1 }
   0x8   : > { %p130_p3 = scmp.ne.s32.totalorder %s6197_s16, %s6193_s15  ;;  %p131_p4 = scmp.eq.s32.totalorder %s5631_s20, 1 }
   0x9   : > { %s6286_s24 = scalar_select %p112_p1, %s6201_s17, %s114_s22  }
   0xa   : > { %p6288_p5 = por %p125_p2, %p124_p0  ;;  %p6292_p6 = por %p131_p4, %p130_p3 }
   0xb   : > { %p5632_p7 = scmp.ge.s32.totalorder %s6205_s18, 1  ;;  %p138_p8 = scmp.lt.s32.totalorder %s6205_s18, 3 }
   0xc   : > { %s7478_s25 = scalar_select %p6288_p5, 1, 0 }
   0xd   : > { %s7479_s26 = scalar_select %p6292_p6, 1, 0 }
   0xe   : > { %p7475_p9 = scmp.eq.s32.totalorder %s6271_s19, 0  ;;  %p6299_p10 = pnand %p5632_p7, %p138_p8 }
   0xf   : > { %s6207_s28 = smov [#allocation2]   ;;  %s6111_s7 = scalar_lea.hbm %s7471_s1, 3072 }
  0x10   : > { %s7480_s27 = scalar_select %p6299_p10, 1, 0 }
  0x11   : > { %s150_s29 = sshll.u32 %s6207_s28, 4  ;;  %p5912_p11 = pneg %p6299_p10  ;;  %s151_s29 = int_to_ptr.vmem [resolvable:$true] %s150_s29 }
  0x12   : > { %p6112_p13 = scmp.ne.s32.totalorder %s7471_s1, %s6111_s7  ;;  %p6118_p3 = scmp.lt.u32.totalorder %s6111_s7, %s7471_s1 }
  0x13   : > { %p6307_p12 = pnand %p7475_p9, %p5912_p11 }
  0x15   : > { %p6113_p0 = pneg %p6307_p12 }
  0x17   : > { %p6114_p1 = pnand %p6113_p0, %p6112_p13 }
  0x19   : > { %p6115_p2 = pneg %p6114_p1 }
  0x1b   : > { %p6120_p4 = pnand %p6118_p3, %p6115_p2 }
  0x1d   : > { %6123 = shalt.err (!%p6120_p4)
}
  0x1e   : > { %s6124_s12 = scalar_lea.vmem %s151_s29, 3072  ;;  %p6132_p9 = scmp.lt.s32.totalorder %s151_s29, %s151_s29 }
  0x1f   : > { %p6125_p7 = scmp.ne.s32.totalorder %s151_s29, %s6124_s12  ;;  %p6133_p6 = scmp.lt.s32.totalorder %s6124_s12, %s6124_s12 }
  0x21   : > { %p6127_p8 = pnand %p6125_p7, %p6113_p0  ;;  %p6134_p5 = por %p6133_p6, %p6132_p9 }
  0x23   : > { %p6128_p11 = pneg %p6127_p8 }
  0x25   : > { %p6135_p10 = pnand %p6134_p5, %p6128_p11 }
  0x27   : > { %6138 = shalt.err (!%p6135_p10)
}
  0x28   : > { %s6208_s13 = smov 192   ;;  %s6209_s14 = smov 12  }
  0x29   : > { %5915 = dma.hbm_to_vmem [thread:$0]  (!%p6307_p12), %s7471_s1, 3072, %s151_s29, [#allocation3], %s6208_s13, %s6208_s13, %s6209_s14  }
  0x2a   : > { %p7482_p13 = scmp.ne.s32.totalorder %s7480_s27, 0 }
  0x2b   : > { %p7483_p1 = scmp.eq.s32.totalorder (!%p7482_p13), %s6271_s19, 0 }
  0x2c   : > { %180 = sbr.rel (%p7482_p13) target bundleno = 2080 (0x820), region = 36 }
  0x33   : > { %6184 = dma.done.wait (%p7483_p1), [#allocation3], 3072   ;;  %p7484_p0 = pmov %p7483_p1 }
  0x34   : > { %v6210_v0 = vmov 0   ;;  %v6007_v1 = vld [vmem:[#allocation2 + $0x4] ss:$12 sps:$4 sm:$0xff]   ;;  %v6009_v2 = vld [vmem:[#allocation2] ss:$12 sps:$4 sm:$0xff]   ;;  %p206_p5 = scmp.lt.s32.totalorder %s6271_s19, 1  ;;  %v508_v49 = vlaneseq }
  0x35   : > { %6186 = vsyncadd (%p7484_p0), [#allocation3], 4294964224  ;;  %407 = vmatprep.mubr.bf16.mxu0 %v6210_v0  ;;  %375 = vmatprep.subr.bf16.mxu0 %v6007_v1  ;;  %v6010_v3 = vld [vmem:[#allocation2 + $0x1c] ss:$12 sps:$4 sm:$0xff]   ;;  %v6012_v4 = vld [vmem:[#allocation2 + $0x18] ss:$12 sps:$4 sm:$0xff]  }
  0x36   : > { %376 = vmatpush1.bf16.msra.mxu0 %v6009_v2  ;;  %v6013_v5 = vld [vmem:[#allocation2 + $0x34] ss:$12 sps:$4 sm:$0xff]   ;;  %s207_s23 = scalar_select %p206_p5, %s6271_s19, 1  ;;  %v6015_v6 = vld [vmem:[#allocation2 + $0x30] ss:$12 sps:$4 sm:$0xff]   ;;  %v6211_v21 = vmov 0.0  }
  0x37   : > { %377 = vmatprep.subr.bf16.mxu0 %v6010_v3  ;;  %v6016_v7 = vld [vmem:[#allocation2 + $0x4c] ss:$12 sps:$4 sm:$0xff]   ;;  %v6018_v8 = vld [vmem:[#allocation2 + $0x48] ss:$12 sps:$4 sm:$0xff]   ;;  %v6019_v9 = vld [vmem:[#allocation2 + $0x64] ss:$12 sps:$4 sm:$0xff]   ;;  %5770 = vmatprep.subr.bf16.mxu1 %v6211_v21 }
  0x38   : > { %s5718_s27 = sshll.u32 %s207_s23, 4  ;;  %v6021_v10 = vld [vmem:[#allocation2 + $0x60] ss:$12 sps:$4 sm:$0xff]   ;;  %v6022_v11 = vld [vmem:[#allocation2 + $0x7c] ss:$12 sps:$4 sm:$0xff]   ;;  %vm6212_vm0 = vmmov 0  }
  0x39   : > { %v6024_v12 = vld [vmem:[#allocation2 + $0x78] ss:$12 sps:$4 sm:$0xff]   ;;  %v6025_v13 = vld [vmem:[#allocation2 + $0x94] ss:$12 sps:$4 sm:$0xff]   ;;  %v6027_v14 = vld [vmem:[#allocation2 + $0x90] ss:$12 sps:$4 sm:$0xff]   ;;  %s210_s30 = scalar_lea.vmem %s7470_s0, %s5718_s27  ;;  %5786 = vmatprep.mubr.msk.bf16.mxu1 %vm6212_vm0, %v6211_v21 }
  0x3a   : > { %378 = vmatpush1.bf16.msra.mxu0 %v6012_v4  ;;  %v6028_v15 = vld [vmem:[#allocation2 + $0xac] ss:$12 sps:$4 sm:$0xff]   ;;  %v6030_v16 = vld [vmem:[#allocation2 + $0xa8] ss:$12 sps:$4 sm:$0xff]   ;;  %v212_v17 = vld [vmem:[%s210_s30] sm:$0xff]  ;;  %s6213_s5 = smov 80  }
  0x3b   : > { %379 = vmatprep.subr.bf16.mxu0 %v6013_v5  ;;  %v213_v18 = vld [vmem:[%s210_s30 + $0x8] sm:$0xff]  ;;  %v6033_v23 = vld [vmem:[#allocation2 + $0x38] ss:$12 sps:$4 sm:$0xff]   ;;  %v6034_v24 = vld [vmem:[#allocation2 + $0x50] ss:$12 sps:$4 sm:$0xff]   ;;  %s6214_s6 = smov 112  }
  0x3c   : > { %v214_v19 = vpack.c.bf16 %v213_v18, %v212_v17  ;;  %v6031_v20 = vld [vmem:[#allocation2 + $0x8] ss:$12 sps:$4 sm:$0xff]   ;;  %v6032_v22 = vld [vmem:[#allocation2 + $0x20] ss:$12 sps:$4 sm:$0xff]   ;;  %v6037_v27 = vld [vmem:[#allocation2 + $0x98] ss:$12 sps:$4 sm:$0xff]  }
  0x3d   : > { %5771 = vmatpush3.bf16.msra.mxu1 %v6031_v20  ;;  %v6035_v25 = vld [vmem:[#allocation2 + $0x68] ss:$12 sps:$4 sm:$0xff]   ;;  %v6036_v26 = vld [vmem:[#allocation2 + $0x80] ss:$12 sps:$4 sm:$0xff]   ;;  %v6038_v28 = vld [vmem:[#allocation2 + $0xb0] ss:$12 sps:$4 sm:$0xff]  }
  0x3e   : > { %380 = vmatpush1.bf16.msra.mxu0 %v6015_v6  ;;  %5772 = vmatprep.subr.bf16.mxu1 %v6211_v21  ;;  %s6215_s7 = smov 64   ;;  %s6216_s8 = smov 96   ;;  %v6220_v47 = vmov 1983009808   ;;  %v509_v53 = vshrl.u32 %v508_v49, 7  ;;  %vm2615_vm1 = vcmask 130048  }
  0x3f   : > { %381 = vmatprep.subr.bf16.mxu0 %v6016_v7  ;;  %s6217_s9 = smov 48   ;;  %s6218_s10 = smov 32   ;;  %v506_v48 = vunpack.c.l.s4 %v6220_v47  ;;  %v6221_v57 = vmov 1934713408   ;;  %vm5410_vm2 = vcmask 261120   ;;  %vm5413_vm3 = vcmask 392192  }
  0x40   : > { %s6219_s11 = smov 16   ;;  %v570_v58 = vunpack.c.l.s4 %v6221_v57  ;;  %vm5416_vm4 = vcmask 523264   ;;  %vm5419_vm5 = vcmask 654336   ;;  %vm5422_vm6 = vcmask 785408   ;;  %s5719_s23 = sshll.u32 %s6271_s19, 8 }
  0x41   : > { %5773 = vmatpush3.bf16.msra.mxu1 %v6032_v22  ;;  %v507_v52 = vunpack.c.0.s8 %v506_v48  ;;  %vm5425_vm7 = vcmask 916480   ;;  %s7427_s29 = scalar_lea.hbm %s7474_s4, %s5719_s23  ;;  %p7485_p9 = scmp.ne.s32.totalorder %s7478_s25, 0 }
  0x42   : > { %382 = vmatpush1.bf16.msra.mxu0 %v6018_v8  ;;  %5774 = vmatprep.subr.bf16.mxu1 %v6211_v21  ;;  %v571_v3 = vunpack.c.0.s8 %v570_v58  ;;  %s6222_s12 = smov [#allocation5]  }
  0x43   : > { %383 = vmatprep.subr.bf16.mxu0 %v6019_v9  ;;  %v6438_v59 = vsub.s32 %v507_v52, %v509_v53  ;;  %s6143_s13 = sshll.u32 %s6222_s12, 4  ;;  %s6144_s13 = int_to_ptr.vmem [resolvable:$false] %s6143_s13 }
  0x45   : > { %5775 = vmatpush3.bf16.msra.mxu1 %v6033_v23 }
  0x46   : > { %384 = vmatpush1.bf16.msra.mxu0 %v6021_v10  ;;  %5776 = vmatprep.subr.bf16.mxu1 %v6211_v21 }
  0x47   : > { %385 = vmatprep.subr.bf16.mxu0 %v6022_v11 }
  0x49   : > { %5777 = vmatpush3.bf16.msra.mxu1 %v6034_v24 }
  0x4a   : > { %386 = vmatpush1.bf16.msra.mxu0 %v6024_v12  ;;  %5778 = vmatprep.subr.bf16.mxu1 %v6211_v21 }
  0x4b   : > { %387 = vmatprep.subr.bf16.mxu0 %v6025_v13 }
  0x4d   : > { %5779 = vmatpush3.bf16.msra.mxu1 %v6035_v25 }
  0x4e   : > { %388 = vmatpush1.bf16.msra.mxu0 %v6027_v14  ;;  %5780 = vmatprep.subr.bf16.mxu1 %v6211_v21 }
  0x4f   : > { %389 = vmatprep.subr.bf16.mxu0 %v6028_v15 }
  0x51   : > { %5781 = vmatpush3.bf16.msra.mxu1 %v6036_v26 }
  0x52   : > { %390 = vmatpush1.bf16.msra.mxu0 %v6030_v16  ;;  %5782 = vmatprep.subr.bf16.mxu1 %v6211_v21  ;;  %v6453_v16 = vsub.s32 %v571_v3, %v509_v53 }
  0x53   : > { %5814 = vmatprep.subr.bf16.mxu0 %v6211_v21 }
  0x55   : > { %408 = vmatmul.mubr.bf16.vlgmr.msra.gmra.mrb[0].mxu0 %v214_v19  ;;  %5783 = vmatpush3.bf16.msra.mxu1 %v6037_v27 }
  0x56   : > { %5784 = vmatprep.subr.bf16.mxu1 %v6211_v21  ;;  %5816 = vmatprep.mubr.msk.bf16.mxu0 %vm6212_vm0, %v6211_v21 }
  0x59   : > { %5785 = vmatpush3.bf16.msra.mxu1 %v6038_v28 }
  0x5a   : > { %5790 = vmatprep.subr.bf16.mxu1 %v6211_v21 }
  0x5c   : > { %5787 = vmatmul.mubr.bf16.vlgmr.msra.gmra.mrb[0].mxu1 %v214_v19 }
  0x5d   : > { %5792 = vmatprep.mubr.msk.bf16.mxu1 %vm6212_vm0, %v6211_v21 }
 0x128   : > { %v6352_v29 = vpop.f32.mrb[0].mxu0 }
 0x129   : > { %473 = vrot.lane.b32.xlu0 %v6352_v29, %s6213_s5  ;;  %461 = vrot.lane.b32.xlu1 %v6352_v29, %s6214_s6  ;;  %v6358_v30 = vpop.f32.mrb[1].mxu0 }
 0x12a   : > { %v6360_v31 = vpop.f32.mrb[2].mxu0 }
 0x12b   : > { %v6364_v32 = vpop.f32.mrb[3].mxu0 }
 0x12d   : > { %479 = vrot.lane.b32.xlu0 %v6352_v29, %s6215_s7  ;;  %467 = vrot.lane.b32.xlu1 %v6352_v29, %s6216_s8 }
 0x131   : > { %485 = vrot.lane.b32.xlu0 %v6352_v29, %s6217_s9  ;;  %783 = vrot.lane.b32.xlu1 %v6358_v30, %s6216_s8 }
 0x135   : > { %491 = vrot.lane.b32.xlu0 %v6352_v29, %s6218_s10  ;;  %469 = vrot.lane.b32.xlu1 %v6360_v31, %s6216_s8 }
 0x139   : > { %777 = vrot.lane.b32.xlu0 %v6358_v30, %s6214_s6  ;;  %475 = vrot.lane.b32.xlu1 %v6360_v31, %s6213_s5 }
 0x13d   : > { %789 = vrot.lane.b32.xlu0 %v6358_v30, %s6213_s5  ;;  %481 = vrot.lane.b32.xlu1 %v6360_v31, %s6215_s7 }
 0x141   : > { %795 = vrot.lane.b32.xlu0 %v6358_v30, %s6215_s7  ;;  %487 = vrot.lane.b32.xlu1 %v6360_v31, %s6217_s9 }
 0x145   : > { %801 = vrot.lane.b32.xlu0 %v6358_v30, %s6217_s9  ;;  %493 = vrot.lane.b32.xlu1 %v6360_v31, %s6218_s10 }
 0x149   : > { %807 = vrot.lane.b32.xlu0 %v6358_v30, %s6218_s10  ;;  %785 = vrot.lane.b32.xlu1 %v6364_v32, %s6216_s8 }
 0x14d   : > { %813 = vrot.lane.b32.xlu0 %v6358_v30, %s6219_s11  ;;  %791 = vrot.lane.b32.xlu1 %v6364_v32, %s6213_s5 }
 0x151   : > { %463 = vrot.lane.b32.xlu0 %v6360_v31, %s6214_s6  ;;  %797 = vrot.lane.b32.xlu1 %v6364_v32, %s6215_s7 }
 0x155   : > { %803 = vrot.lane.b32.xlu1 %v6364_v32, %s6217_s9  ;;  %779 = vrot.lane.b32.xlu0 %v6364_v32, %s6214_s6 }
 0x159   : > { %809 = vrot.lane.b32.xlu1 %v6364_v32, %s6218_s10 }
 0x15d   : > { %815 = vrot.lane.b32.xlu1 %v6364_v32, %s6219_s11 }
 0x19b   : > { %v6414_v33 = vpop.permute.xlu0 %473  ;;  %v6416_v34 = vpop.permute.xlu1 %461 }
 0x19f   : > { %v6418_v35 = vpop.permute.xlu0 %479  ;;  %v6420_v36 = vpop.permute.xlu1 %467 }
 0x1a3   : > { %v6422_v37 = vpop.permute.xlu0 %485  ;;  %v784_v38 = vpop.permute.xlu1 %783 }
 0x1a4   : > { %v819_v60 = vcombine.low %v6358_v30, %v784_v38  ;;  %v820_v4 = vcombine.high %v6358_v30, %v784_v38 }
 0x1a6   : > { %v827_v7 = vrot.slane %v819_v60, %v6438_v59  ;;  %v834_v17 = vrot.slane %v820_v4, %v6438_v59 }
 0x1a7   : > { %v6424_v39 = vpop.permute.xlu0 %491  ;;  %v6426_v40 = vpop.permute.xlu1 %469 }
 0x1ab   : > { %v778_v41 = vpop.permute.xlu0 %777  ;;  %v6428_v42 = vpop.permute.xlu1 %475 }
 0x1af   : > { %v790_v43 = vpop.permute.xlu0 %789  ;;  %v6430_v44 = vpop.permute.xlu1 %481 }
 0x1b0   : > { %v835_v54 = vcombine.low %v778_v41, %v790_v43  ;;  %v836_v61 = vcombine.high %v778_v41, %v790_v43 }
 0x1b2   : > { %v843_v0 = vrot.slane %v835_v54, %v6438_v59  ;;  %v850_v8 = vrot.slane %v836_v61, %v6438_v59 }
 0x1b3   : > { %v796_v45 = vpop.permute.xlu0 %795  ;;  %v6432_v46 = vpop.permute.xlu1 %487 }
 0x1b4   : > { %v883_v15 = vcombine.low %v827_v7, %v843_v0  ;;  %v899_v23 = vcombine.low %v834_v17, %v850_v8  ;;  %v884_v24 = vcombine.high %v827_v7, %v843_v0 }
 0x1b6   : > { %v891_v27 = vrot.slane %v883_v15, %v6453_v16  ;;  %v907_v48 = vrot.slane %v899_v23, %v6453_v16  ;;  %v898_v49 = vrot.slane %v884_v24, %v6453_v16 }
 0x1b7   : > { %v802_v50 = vpop.permute.xlu0 %801  ;;  %v6434_v51 = vpop.permute.xlu1 %493 }
 0x1bb   : > { %v808_v55 = vpop.permute.xlu0 %807  ;;  %v6436_v56 = vpop.permute.xlu1 %785 }
 0x1bc   : > { %v851_v62 = vcombine.low %v796_v45, %v808_v55  ;;  %v852_v63 = vcombine.high %v796_v45, %v808_v55  ;;  %v900_v45 = vcombine.high %v834_v17, %v850_v8  ;;  %v955_v55 = vcombine.low %v6364_v32, %v6436_v56 }
 0x1be   : > { %v859_v9 = vrot.slane %v851_v62, %v6438_v59  ;;  %v866_v10 = vrot.slane %v852_v63, %v6438_v59  ;;  %v914_v60 = vrot.slane %v900_v45, %v6453_v16 }
 0x1bf   : > { %v814_v1 = vpop.permute.xlu0 %813  ;;  %v6442_v2 = vpop.permute.xlu1 %791 }
 0x1c0   : > { %v867_v5 = vcombine.low %v802_v50, %v814_v1  ;;  %v868_v6 = vcombine.high %v802_v50, %v814_v1 }
 0x1c2   : > { %v875_v11 = vrot.slane %v867_v5, %v6438_v59  ;;  %v882_v12 = vrot.slane %v868_v6, %v6438_v59  ;;  %v963_v6 = vrot.slane %v955_v55, %v6438_v59 }
 0x1c3   : > { %v6451_v13 = vpop.permute.xlu0 %463  ;;  %v798_v14 = vpop.permute.xlu1 %797 }
 0x1c4   : > { %v915_v18 = vcombine.low %v859_v9, %v875_v11  ;;  %v931_v19 = vcombine.low %v866_v10, %v882_v12  ;;  %v916_v20 = vcombine.high %v859_v9, %v875_v11  ;;  %v932_v28 = vcombine.high %v866_v10, %v882_v12 }
 0x1c5   : > { %v956_v10 = vcombine.high %v6364_v32, %v6436_v56 }
 0x1c6   : > { %v923_v22 = vrot.slane %v915_v18, %v6453_v16  ;;  %v939_v30 = vrot.slane %v931_v19, %v6453_v16  ;;  %v930_v38 = vrot.slane %v916_v20, %v6453_v16  ;;  %v946_v54 = vrot.slane %v932_v28, %v6453_v16 }
 0x1c7   : > { %v804_v25 = vpop.permute.xlu1 %803  ;;  %v780_v26 = vpop.permute.xlu0 %779  ;;  %v970_v32 = vrot.slane %v956_v10, %v6438_v59 }
 0x1c8   : > { %v948_v41 = vcombine.high %v891_v27, %v923_v22  ;;  %v947_v43 = vcombine.low %v891_v27, %v923_v22  ;;  %v971_v47 = vcombine.low %v780_v26, %v6442_v2  ;;  %v951_v57 = vcombine.low %v907_v48, %v939_v30 }
 0x1c9   : > { %v949_v58 = vcombine.low %v898_v49, %v930_v38  ;;  %v972_v61 = vcombine.high %v780_v26, %v6442_v2  ;;  %v953_v4 = vcombine.low %v914_v60, %v946_v54  ;;  %v950_v5 = vcombine.high %v898_v49, %v930_v38 }
 0x1ca   : > { %v1424_v52 = vpack.c.bf16 %v948_v41, %v948_v41  ;;  %v1423_v53 = vpack.c.bf16 %v947_v43, %v947_v43  ;;  %v979_v62 = vrot.slane %v971_v47, %v6438_v59  ;;  %v1427_v1 = vpack.c.bf16 %v951_v57, %v951_v57 }
 0x1cb   : > { %v810_v50 = vpop.permute.xlu1 %809  ;;  %v1425_v3 = vpack.c.bf16 %v949_v58, %v949_v58  ;;  %v986_v17 = vrot.slane %v972_v61, %v6438_v59  ;;  %v1429_v18 = vpack.c.bf16 %v953_v4, %v953_v4  ;;  %v1426_v19 = vpack.c.bf16 %v950_v5, %v950_v5 }
 0x1cc   : > { %1615 = vxpose.xlu1.c.b16.start.end [1/1] (short) (narrow) %v1424_v52, 16  ;;  %1599 = vxpose.xlu0.c.b16.start.end [1/1] (short) (narrow) %v1423_v53, 16  ;;  %v987_v63 = vcombine.low %v798_v14, %v810_v50  ;;  %v988_v7 = vcombine.high %v798_v14, %v810_v50  ;;  %v1019_v15 = vcombine.low %v963_v6, %v979_v62 }
 0x1cd   : > { %v952_v20 = vcombine.high %v907_v48, %v939_v30  ;;  %v1020_v23 = vcombine.high %v963_v6, %v979_v62  ;;  %v954_v38 = vcombine.high %v914_v60, %v946_v54  ;;  %v1035_v43 = vcombine.low %v970_v32, %v986_v17 }
 0x1ce   : > { %v995_v2 = vrot.slane %v987_v63, %v6438_v59  ;;  %v1002_v14 = vrot.slane %v988_v7, %v6438_v59  ;;  %v1027_v56 = vrot.slane %v1019_v15, %v6453_v16  ;;  %v1036_v55 = vcombine.high %v970_v32, %v986_v17 }
 0x1cf   : > { %v816_v0 = vpop.permute.xlu1 %815  ;;  %v1428_v28 = vpack.c.bf16 %v952_v20, %v952_v20  ;;  %v1034_v30 = vrot.slane %v1020_v23, %v6453_v16  ;;  %v1430_v50 = vpack.c.bf16 %v954_v38, %v954_v38  ;;  %v1043_v53 = vrot.slane %v1035_v43, %v6453_v16 }
 0x1d0   : > { %v1003_v8 = vcombine.low %v804_v25, %v816_v0  ;;  %v1004_v9 = vcombine.high %v804_v25, %v816_v0  ;;  %1663 = vxpose.xlu1.c.b16.start.end [1/1] (short) (narrow) %v1427_v1, 16  ;;  %1631 = vxpose.xlu0.c.b16.start.end [1/1] (short) (narrow) %v1425_v3, 16  ;;  %v1050_v62 = vrot.slane %v1036_v55, %v6453_v16 }
 0x1d1   : > { %v671_v55 = vcombine.low %v6430_v44, %v6434_v51 }
 0x1d2   : > { %v1011_v11 = vrot.slane %v1003_v8, %v6438_v59  ;;  %v1018_v12 = vrot.slane %v1004_v9, %v6438_v59  ;;  %v6490_v8 = vpop.f32.mrb[0].mxu1 }
 0x1d3   : > { %v5788_v9 = vpop.f32.mrb[1].mxu1 }
 0x1d4   : > { %v1051_v22 = vcombine.low %v995_v2, %v1011_v11  ;;  %v1052_v24 = vcombine.high %v995_v2, %v1011_v11  ;;  %1695 = vxpose.xlu1.c.b16.start.end [1/1] (short) (narrow) %v1429_v18, 16  ;;  %1647 = vxpose.xlu0.c.b16.start.end [1/1] (short) (narrow) %v1426_v19, 16  ;;  %v1067_v27 = vcombine.low %v1002_v14, %v1018_v12  ;;  %v6492_v10 = vpop.f32.mrb[2].mxu1 }
 0x1d5   : > { %v1068_v49 = vcombine.high %v1002_v14, %v1018_v12  ;;  %v5789_v2 = vpop.f32.mrb[3].mxu1  ;;  %v503_v19 = vcombine.low %v6352_v29, %v6420_v36  ;;  %v519_v14 = vcombine.low %v6416_v34, %v6414_v33 }
 0x1d6   : > { %v1059_v25 = vrot.slane %v1051_v22, %v6453_v16  ;;  %v1066_v26 = vrot.slane %v1052_v24, %v6453_v16  ;;  %v1075_v48 = vrot.slane %v1067_v27, %v6453_v16  ;;  %v504_v22 = vcombine.high %v6352_v29, %v6420_v36 }
 0x1d7   : > { %v1082_v54 = vrot.slane %v1068_v49, %v6453_v16  ;;  %v520_v24 = vcombine.high %v6416_v34, %v6414_v33  ;;  %v511_v32 = vrot.slane %v503_v19, %v6438_v59  ;;  %v527_v27 = vrot.slane %v519_v14, %v6438_v59 }
 0x1d8   : > { %v1083_v41 = vcombine.low %v1027_v56, %v1059_v25  ;;  %1679 = vxpose.xlu0.c.b16.start.end [1/1] (short) (narrow) %v1428_v28, 16  ;;  %v1085_v47 = vcombine.low %v1034_v30, %v1066_v26  ;;  %v1084_v52 = vcombine.high %v1027_v56, %v1059_v25  ;;  %v1087_v58 = vcombine.low %v1043_v53, %v1075_v48 }
 0x1d9   : > { %v1086_v61 = vcombine.high %v1034_v30, %v1066_v26  ;;  %v1089_v0 = vcombine.low %v1050_v62, %v1082_v54  ;;  %v1088_v3 = vcombine.high %v1043_v53, %v1075_v48  ;;  %v1090_v6 = vcombine.high %v1050_v62, %v1082_v54 }
 0x1da   : > { %v1431_v45 = vpack.c.bf16 %v1083_v41, %v1083_v41  ;;  %v1433_v57 = vpack.c.bf16 %v1085_v47, %v1085_v47  ;;  %v1432_v60 = vpack.c.bf16 %v1084_v52, %v1084_v52  ;;  %v1435_v63 = vpack.c.bf16 %v1087_v58, %v1087_v58 }
 0x1db   : > { %v1434_v1 = vpack.c.bf16 %v1086_v61, %v1086_v61  ;;  %v1437_v4 = vpack.c.bf16 %v1089_v0, %v1089_v0  ;;  %v1436_v5 = vpack.c.bf16 %v1088_v3, %v1088_v3  ;;  %v1438_v7 = vpack.c.bf16 %v1090_v6, %v1090_v6 }
 0x1dc   : > { %1727 = vxpose.xlu1.c.b16.start.end [1/1] (short) (narrow) %v1431_v45, 16  ;;  %1711 = vxpose.xlu0.c.b16.start.end [1/1] (short) (narrow) %v1430_v50, 16  ;;  %v655_v56 = vcombine.low %v6451_v13, %v6428_v42  ;;  %v656_v25 = vcombine.high %v6451_v13, %v6428_v42  ;;  %v518_v28 = vrot.slane %v504_v22, %v6438_v59 }
 0x1dd   : > { %v639_v36 = vcombine.low %v6360_v31, %v6426_v40  ;;  %v640_v33 = vcombine.high %v6360_v31, %v6426_v40  ;;  %v534_v34 = vrot.slane %v520_v24, %v6438_v59  ;;  %v567_v38 = vcombine.low %v511_v32, %v527_v27 }
 0x1de   : > { %v568_v41 = vcombine.high %v511_v32, %v527_v27  ;;  %v663_v42 = vrot.slane %v655_v56, %v6438_v59  ;;  %v670_v13 = vrot.slane %v656_v25, %v6438_v59  ;;  %v535_v47 = vcombine.low %v6418_v35, %v6424_v39 }
 0x1df   : > { %v583_v43 = vcombine.low %v518_v28, %v534_v34  ;;  %v584_v45 = vcombine.high %v518_v28, %v534_v34  ;;  %v536_v49 = vcombine.high %v6418_v35, %v6424_v39  ;;  %v654_v40 = vrot.slane %v640_v33, %v6438_v59 }
 0x1e0   : > { %1759 = vxpose.xlu1.c.b16.start.end [1/1] (short) (narrow) %v1433_v57, 16  ;;  %1743 = vxpose.xlu0.c.b16.start.end [1/1] (short) (narrow) %v1432_v60, 16  ;;  %v6542_v52 = vrot.slane %v567_v38, %v6453_v16  ;;  %v6545_v53 = vrot.slane %v568_v41, %v6453_v16  ;;  %v672_v57 = vcombine.high %v6430_v44, %v6434_v51 }
 0x1e1   : > { %v719_v39 = vcombine.low %v654_v40, %v670_v13  ;;  %v6554_v61 = vrot.slane %v583_v43, %v6453_v16  ;;  %v6557_v62 = vrot.slane %v584_v45, %v6453_v16  ;;  %v720_v0 = vcombine.high %v654_v40, %v670_v13 }
 0x1e2   : > { %v6563_v44 = vrot.slane %v536_v49, %v6438_v59  ;;  %v6573_v6 = vrot.slane %v672_v57, %v6438_v59 }
 0x1e4   : > { %1791 = vxpose.xlu1.c.b16.start.end [1/1] (short) (narrow) %v1435_v63, 16  ;;  %1775 = vxpose.xlu0.c.b16.start.end [1/1] (short) (narrow) %v1434_v1, 16  ;;  %v6560_v63 = vrot.slane %v535_v47, %v6438_v59 }
 0x1e8   : > { %1823 = vxpose.xlu1.c.b16.start.end [1/1] (short) (narrow) %v1437_v4, 16  ;;  %1807 = vxpose.xlu0.c.b16.start.end [1/1] (short) (narrow) %v1436_v5, 16  ;;  %v6570_v5 = vrot.slane %v671_v55, %v6438_v59 }
 0x1ec   : > { %499 = vrot.lane.b32.xlu1 %v6360_v31, %s6219_s11  ;;  %1839 = vxpose.xlu0.c.b16.start.end [1/1] (short) (narrow) %v1438_v7, 16  ;;  %v647_v31 = vrot.slane %v639_v36, %v6438_v59 }
 0x1ee   : > { %v703_v58 = vcombine.low %v647_v31, %v663_v42  ;;  %v704_v35 = vcombine.high %v647_v31, %v663_v42 }
 0x1f0   : > { %v6579_v2 = vrot.slane %v703_v58, %v6453_v16 }
 0x1f5   : > { %497 = vrot.lane.b32.xlu0 %v6352_v29, %s6219_s11 }
 0x232   : > { %v6494_v11 = vpop.trf.xlu1  ;;  %v6496_v12 = vpop.trf.xlu0 }
 0x236   : > { %v6498_v15 = vpop.trf.xlu0  ;;  %v6500_v17 = vpop.trf.xlu1 }
 0x237   : > { %v1855_v54 = vcombine.low %v6496_v12, %v6500_v17  ;;  %v1856_v51 = vcombine.high %v6496_v12, %v6500_v17  ;;  %v6582_v12 = vrot.slane %v704_v35, %v6453_v16 }
 0x239   : > { %v1863_v17 = vrot.slane %v1855_v54, %v6438_v59  ;;  %v1870_v56 = vrot.slane %v1856_v51, %v6438_v59 }
 0x23a   : > { %v6502_v18 = vpop.trf.xlu0  ;;  %v1703_v20 = vpop.trf.xlu1 }
 0x23b   : > { %v1871_v50 = vcombine.low %v6498_v15, %v1703_v20  ;;  %v1872_v3 = vcombine.high %v6498_v15, %v1703_v20  ;;  %v6585_v15 = vrot.slane %v719_v39, %v6453_v16  ;;  %v6589_v20 = vrot.slane %v720_v0, %v6453_v16 }
 0x23d   : > { %v1879_v4 = vrot.slane %v1871_v50, %v6438_v59  ;;  %v1886_v25 = vrot.slane %v1872_v3, %v6438_v59 }
 0x23e   : > { %v6510_v23 = vpop.trf.xlu0 }
 0x23f   : > { %v1991_v14 = vcombine.low %v6494_v11, %v6510_v23  ;;  %v1919_v27 = vcombine.low %v1863_v17, %v1879_v4  ;;  %v1920_v41 = vcombine.high %v1863_v17, %v1879_v4  ;;  %v1992_v42 = vcombine.high %v6494_v11, %v6510_v23 }
 0x240   : > { %v1935_v31 = vcombine.low %v1870_v56, %v1886_v25  ;;  %v1936_v40 = vcombine.high %v1870_v56, %v1886_v25 }
 0x241   : > { %v1999_v43 = vrot.slane %v1991_v14, %v6438_v59  ;;  %v2006_v39 = vrot.slane %v1992_v42, %v6438_v59  ;;  %v1934_v3 = vrot.slane %v1920_v41, %v6453_v16 }
 0x242   : > { %v6519_v26 = vpop.trf.xlu1  ;;  %v6523_v29 = vpop.trf.xlu0  ;;  %v1950_v42 = vrot.slane %v1936_v40, %v6453_v16 }
 0x243   : > { %v2007_v7 = vcombine.low %v6502_v18, %v6523_v29  ;;  %v2008_v28 = vcombine.high %v6502_v18, %v6523_v29 }
 0x245   : > { %v2015_v36 = vrot.slane %v2007_v7, %v6438_v59  ;;  %v2022_v50 = vrot.slane %v2008_v28, %v6438_v59  ;;  %v1927_v7 = vrot.slane %v1919_v27, %v6453_v16 }
 0x246   : > { %v1767_v30 = vpop.trf.xlu1  ;;  %v6534_v48 = vpop.trf.xlu0 }
 0x247   : > { %v2055_v55 = vcombine.low %v1999_v43, %v2015_v36  ;;  %v2056_v57 = vcombine.high %v1999_v43, %v2015_v36  ;;  %v2071_v17 = vcombine.low %v2006_v39, %v2022_v50  ;;  %v2072_v36 = vcombine.high %v2006_v39, %v2022_v50 }
 0x249   : > { %v2070_v14 = vrot.slane %v2056_v57, %v6453_v16  ;;  %v2079_v41 = vrot.slane %v2071_v17, %v6453_v16  ;;  %v6643_v50 = vrot.slane %v2072_v36, %v6453_v16 }
 0x24a   : > { %v1799_v60 = vpop.trf.xlu1  ;;  %v1783_v1 = vpop.trf.xlu0 }
 0x24b   : > { %v1887_v9 = vcombine.low %v6519_v26, %v1799_v60  ;;  %v1888_v33 = vcombine.high %v6519_v26, %v1799_v60 }
 0x24d   : > { %v1895_v34 = vrot.slane %v1887_v9, %v6438_v59  ;;  %v1902_v11 = vrot.slane %v1888_v33, %v6438_v59  ;;  %v1943_v9 = vrot.slane %v1935_v31, %v6453_v16 }
 0x24e   : > { %v1831_v19 = vpop.trf.xlu1  ;;  %v1815_v32 = vpop.trf.xlu0 }
 0x24f   : > { %v1903_v22 = vcombine.low %v1767_v30, %v1831_v19  ;;  %v1904_v24 = vcombine.high %v1767_v30, %v1831_v19  ;;  %v2023_v13 = vcombine.low %v6534_v48, %v1815_v32  ;;  %v2024_v30 = vcombine.high %v6534_v48, %v1815_v32 }
 0x251   : > { %v1911_v38 = vrot.slane %v1903_v22, %v6438_v59  ;;  %v1918_v18 = vrot.slane %v1904_v24, %v6438_v59  ;;  %v2031_v23 = vrot.slane %v2023_v13, %v6438_v59  ;;  %v2038_v48 = vrot.slane %v2024_v30, %v6438_v59 }
 0x252   : > { %v1847_v47 = vpop.trf.xlu0  ;;  %v2063_v24 = vrot.slane %v2055_v55, %v6453_v16 }
 0x253   : > { %v1951_v29 = vcombine.low %v1895_v34, %v1911_v38  ;;  %v1952_v45 = vcombine.high %v1895_v34, %v1911_v38  ;;  %v2039_v26 = vcombine.low %v1783_v1, %v1847_v47  ;;  %v2040_v49 = vcombine.high %v1783_v1, %v1847_v47 }
 0x254   : > { %v1967_v0 = vcombine.low %v1902_v11, %v1918_v18  ;;  %v1968_v19 = vcombine.high %v1902_v11, %v1918_v18 }
 0x255   : > { %v2047_v58 = vrot.slane %v2039_v26, %v6438_v59  ;;  %v2054_v35 = vrot.slane %v2040_v49, %v6438_v59  ;;  %v1966_v54 = vrot.slane %v1952_v45, %v6453_v16  ;;  %v1959_v60 = vrot.slane %v1951_v29, %v6453_v16 }
 0x256   : > { %v1975_v28 = vrot.slane %v1967_v0, %v6453_v16  ;;  %v1982_v13 = vrot.slane %v1968_v19, %v6453_v16 }
 0x257   : > { %v2087_v1 = vcombine.low %v2031_v23, %v2047_v58  ;;  %v2088_v51 = vcombine.high %v2031_v23, %v2047_v58  ;;  %v2103_v4 = vcombine.low %v2038_v48, %v2054_v35  ;;  %v6623_v56 = vcombine.low %v1934_v3, %v1966_v54 }
 0x258   : > { %v6625_v25 = vcombine.low %v1927_v7, %v1959_v60  ;;  %v1984_v34 = vcombine.high %v1927_v7, %v1959_v60  ;;  %v2104_v30 = vcombine.high %v2038_v48, %v2054_v35  ;;  %v1986_v31 = vcombine.high %v1934_v3, %v1966_v54 }
 0x259   : > { %v2102_v22 = vrot.slane %v2088_v51, %v6453_v16  ;;  %v2095_v32 = vrot.slane %v2087_v1, %v6453_v16  ;;  %v2111_v38 = vrot.slane %v2103_v4, %v6453_v16  ;;  %v6645_v40 = vcombine.low %v1943_v9, %v1975_v28 }
 0x25a   : > { %v2139_v57 = vshrl.u32 %v1984_v34, 16  ;;  %v6649_v11 = vcombine.high %v1943_v9, %v1975_v28  ;;  %v2147_v58 = vshrl.u32 %v6623_v56, 16  ;;  %v2118_v60 = vrot.slane %v2104_v30, %v6453_v16 }
 0x25b   : > { %v6628_v27 = vcombine.low %v2070_v14, %v2102_v22  ;;  %v6630_v33 = vcombine.low %v2063_v24, %v2095_v32  ;;  %v2122_v45 = vcombine.high %v2070_v14, %v2102_v22  ;;  %v2120_v47 = vcombine.high %v2063_v24, %v2095_v32 }
 0x25c   : > { %v6647_v55 = vcombine.low %v2079_v41, %v2111_v38  ;;  %v6663_v7 = vcombine.high %v2079_v41, %v2111_v38  ;;  %v2155_v9 = vshrl.u32 %v1986_v31, 16  ;;  %v2131_v17 = vshrl.u32 %v6625_v25, 16 }
 0x25d   : > { %v2145_v18 = vpack.i.b16 %v6628_v27, %v6623_v56  ;;  %v2129_v29 = vpack.i.b16 %v6630_v33, %v6625_v25  ;;  %v2153_v35 = vpack.i.b16 %v2122_v45, %v1986_v31  ;;  %v2137_v39 = vpack.i.b16 %v2120_v47, %v1984_v34 }
 0x25e   : > { %v500_v43 = vpop.permute.xlu1 %499  ;;  %v2140_v54 = vshrl.u32 %v2120_v47, 16  ;;  %v2161_v4 = vpack.i.b16 %v6647_v55, %v6645_v40  ;;  %v6672_v32 = vcombine.low %v6643_v50, %v2118_v60  ;;  %v2156_v56 = vshrl.u32 %v2122_v45, 16 }
 0x25f   : > { %v687_v26 = vcombine.low %v6432_v46, %v500_v43  ;;  %v688_v49 = vcombine.high %v6432_v46, %v500_v43  ;;  %2255 = vxpose.xlu1.c.b16.start.end [1/1] (short) (narrow) %v2145_v18, 16  ;;  %2191 = vxpose.xlu0.c.b16.start.end [1/1] (short) (narrow) %v2129_v29, 16  ;;  %v6654_v46 = vcombine.low %v1950_v42, %v1982_v13 }
 0x260   : > { %v2141_v24 = vpack.i.b16 %v2140_v54, %v2139_v57  ;;  %v6685_v45 = vcombine.high %v1950_v42, %v1982_v13  ;;  %v2172_v54 = vshrl.u32 %v6663_v7, 16 }
 0x261   : > { %v695_v23 = vrot.slane %v687_v26, %v6438_v59  ;;  %v702_v48 = vrot.slane %v688_v49, %v6438_v59  ;;  %v2171_v26 = vshrl.u32 %v6649_v11, 16  ;;  %v2177_v31 = vpack.i.b16 %v6672_v32, %v6654_v46 }
 0x263   : > { %v735_v0 = vcombine.low %v6570_v5, %v695_v23  ;;  %v736_v1 = vcombine.high %v6570_v5, %v695_v23  ;;  %v751_v51 = vcombine.low %v6573_v6, %v702_v48  ;;  %v752_v3 = vcombine.high %v6573_v6, %v702_v48  ;;  %2287 = vxpose.xlu1.c.b16.start.end [1/1] (short) (narrow) %v2153_v35, 16 }
 0x264   : > { %2223 = vxpose.xlu0.c.b16.start.end [1/1] (short) (narrow) %v2137_v39, 16  ;;  %v2148_v6 = vshrl.u32 %v6628_v27, 16  ;;  %v2164_v35 = vshrl.u32 %v6647_v55, 16  ;;  %v2126_v39 = vcombine.high %v6643_v50, %v2118_v60 }
 0x265   : > { %v743_v19 = vrot.slane %v735_v0, %v6453_v16  ;;  %v750_v14 = vrot.slane %v736_v1, %v6453_v16  ;;  %v759_v5 = vrot.slane %v751_v51, %v6453_v16  ;;  %v766_v22 = vrot.slane %v752_v3, %v6453_v16 }
 0x266   : > { %v2149_v47 = vpack.i.b16 %v2148_v6, %v2147_v58  ;;  %v2173_v6 = vpack.i.b16 %v2172_v54, %v2171_v26 }
 0x267   : > { %v767_v28 = vcombine.low %v6579_v2, %v743_v19  ;;  %v768_v36 = vcombine.high %v6579_v2, %v743_v19  ;;  %v769_v25 = vcombine.low %v6582_v12, %v750_v14  ;;  %v770_v34 = vcombine.high %v6582_v12, %v750_v14  ;;  %2319 = vxpose.xlu1.c.b16.start.end [1/1] (short) (narrow) %v2161_v4, 16  ;;  %v498_v43 = vpop.permute.xlu0 %497 }
 0x268   : > { %v771_v38 = vcombine.low %v6585_v15, %v759_v5  ;;  %v772_v41 = vcombine.high %v6585_v15, %v759_v5  ;;  %v773_v30 = vcombine.low %v6589_v20, %v766_v22  ;;  %v774_v27 = vcombine.high %v6589_v20, %v766_v22  ;;  %2239 = vxpose.xlu0.c.b16.start.end [1/1] (short) (narrow) %v2141_v24, 16 }
 0x269   : > { %v551_v18 = vcombine.low %v6422_v37, %v498_v43  ;;  %v552_v29 = vcombine.high %v6422_v37, %v498_v43  ;;  %v2163_v2 = vshrl.u32 %v6645_v40, 16  ;;  %v2169_v12 = vpack.i.b16 %v6663_v7, %v6649_v11 }
 0x26a   : > { %v2132_v15 = vshrl.u32 %v6630_v33, 16  ;;  %v2157_v37 = vpack.i.b16 %v2156_v56, %v2155_v9  ;;  %v5666_v57 = vpack.c.bf16 %v771_v38, %v767_v28  ;;  %v5667_v40 = vpack.c.bf16 %v773_v30, %v769_v25 }
 0x26b   : > { %v559_v20 = vrot.slane %v551_v18, %v6438_v59  ;;  %v566_v49 = vrot.slane %v552_v29, %v6438_v59  ;;  %v5670_v42 = vpack.c.bf16 %v772_v41, %v768_v36  ;;  %v5671_v13 = vpack.c.bf16 %v774_v27, %v770_v34  ;;  %2351 = vxpose.xlu1.c.b16.start.end [1/1] (short) (narrow) %v2169_v12, 16 }
 0x26c   : > { %2271 = vxpose.xlu0.c.b16.start.end [1/1] (short) (narrow) %v2149_v47, 16  ;;  %v2133_v58 = vpack.i.b16 %v2132_v15, %v2131_v17  ;;  %v1462_v3 = vrot.slane %v5666_v57, %v6438_v59  ;;  %v2165_v22 = vpack.i.b16 %v2164_v35, %v2163_v2  ;;  %v2185_v24 = vpack.i.b16 %v2126_v39, %v6685_v45 }
 0x26d   : > { %v599_v23 = vcombine.low %v6560_v63, %v559_v20  ;;  %v600_v48 = vcombine.high %v6560_v63, %v559_v20  ;;  %v615_v33 = vcombine.low %v6563_v44, %v566_v49  ;;  %v616_v11 = vcombine.high %v6563_v44, %v566_v49 }
 0x26e   : > { %v1470_v44 = vrot.slane %v5667_v40, %v6438_v59  ;;  %v1530_v4 = vrot.slane %v5670_v42, %v6438_v59  ;;  %v1538_v55 = vrot.slane %v5671_v13, %v6438_v59  ;;  %v2179_v27 = vshrl.u32 %v6654_v46, 16 }
 0x26f   : > { %v607_v0 = vrot.slane %v599_v23, %v6453_v16  ;;  %v614_v1 = vrot.slane %v600_v48, %v6453_v16  ;;  %v623_v51 = vrot.slane %v615_v33, %v6453_v16  ;;  %v630_v63 = vrot.slane %v616_v11, %v6453_v16  ;;  %2383 = vxpose.xlu1.c.b16.start.end [1/1] (short) (narrow) %v2177_v31, 16 }
 0x270   : > { %2303 = vxpose.xlu0.c.b16.start.end [1/1] (short) (narrow) %v2157_v37, 16  ;;  %v1487_v25 = vcombine.low %v1462_v3, %v1470_v44  ;;  %v1555_v34 = vcombine.low %v1530_v4, %v1538_v55  ;;  %v1556_v38 = vcombine.high %v1530_v4, %v1538_v55  ;;  %v2180_v43 = vshrl.u32 %v6672_v32, 16 }
 0x271   : > { %v631_v50 = vcombine.low %v6542_v52, %v607_v0  ;;  %v632_v60 = vcombine.high %v6542_v52, %v607_v0  ;;  %v633_v7 = vcombine.low %v6545_v53, %v614_v1  ;;  %v634_v9 = vcombine.high %v6545_v53, %v614_v1 }
 0x272   : > { %v635_v17 = vcombine.low %v6554_v61, %v623_v51  ;;  %v636_v19 = vcombine.high %v6554_v61, %v623_v51  ;;  %v637_v14 = vcombine.low %v6557_v62, %v630_v63  ;;  %v638_v5 = vcombine.high %v6557_v62, %v630_v63 }
 0x273   : > { %2207 = vxpose.xlu1.c.b16.start.end [1/1] (short) (narrow) %v2133_v58, 16  ;;  %v1488_v53 = vcombine.high %v1462_v3, %v1470_v44  ;;  %v2187_v18 = vshrl.u32 %v6685_v45, 16  ;;  %v2188_v29 = vshrl.u32 %v2126_v39, 16  ;;  %v1495_v26 = vrot.slane %v1487_v25, %v6453_v16 }
 0x274   : > { %v5664_v56 = vpack.c.bf16 %v635_v17, %v631_v50  ;;  %v5665_v28 = vpack.c.bf16 %v637_v14, %v633_v7  ;;  %v5668_v52 = vpack.c.bf16 %v636_v19, %v632_v60  ;;  %v5669_v36 = vpack.c.bf16 %v638_v5, %v634_v9  ;;  %2335 = vxpose.xlu0.c.b16.start.end [1/1] (short) (narrow) %v2165_v22, 16 }
 0x275   : > { %v1563_v20 = vrot.slane %v1555_v34, %v6453_v16  ;;  %v1502_v49 = vrot.slane %v1488_v53, %v6453_v16  ;;  %v1570_v31 = vrot.slane %v1556_v38, %v6453_v16  ;;  %v2181_v57 = vpack.i.b16 %v2180_v43, %v2179_v27 }
 0x276   : > { %v1446_v61 = vrot.slane %v5664_v56, %v6438_v59  ;;  %v1454_v41 = vrot.slane %v5665_v28, %v6438_v59  ;;  %v1514_v62 = vrot.slane %v5668_v52, %v6438_v59  ;;  %v1522_v30 = vrot.slane %v5669_v36, %v6438_v59 }
 0x277   : > { %2415 = vxpose.xlu1.c.b16.start.end [1/1] (short) (narrow) %v2185_v24, 16  ;;  %v2189_v40 = vpack.i.b16 %v2188_v29, %v2187_v18 }
 0x278   : > { %v1471_v2 = vcombine.low %v1446_v61, %v1454_v41  ;;  %v1472_v12 = vcombine.high %v1446_v61, %v1454_v41  ;;  %v1539_v47 = vcombine.low %v1514_v62, %v1522_v30  ;;  %v1540_v15 = vcombine.high %v1514_v62, %v1522_v30  ;;  %2367 = vxpose.xlu0.c.b16.start.end [1/1] (short) (narrow) %v2173_v6, 16 }
 0x27a   : > { %v1479_v46 = vrot.slane %v1471_v2, %v6453_v16  ;;  %v1547_v32 = vrot.slane %v1539_v47, %v6453_v16  ;;  %v1486_v45 = vrot.slane %v1472_v12, %v6453_v16  ;;  %v1554_v37 = vrot.slane %v1540_v15, %v6453_v16 }
 0x27b   : > { %1093 = vrot.lane.b32.xlu1 %v6490_v8, %s6214_s6 }
 0x27c   : > { %v6736_v42 = vcombine.low %v1479_v46, %v1495_v26  ;;  %v6738_v13 = vcombine.low %v1547_v32, %v1563_v20  ;;  %v6740_v23 = vcombine.low %v1486_v45, %v1502_v49  ;;  %v6742_v48 = vcombine.low %v1554_v37, %v1570_v31  ;;  %2399 = vxpose.xlu0.c.b16.start.end [1/1] (short) (narrow) %v2181_v57, 16 }
 0x27d   : > { %v6744_v33 = vcombine.high %v1486_v45, %v1502_v49  ;;  %v6746_v11 = vcombine.high %v1554_v37, %v1570_v31  ;;  %v6748_v58 = vcombine.high %v1479_v46, %v1495_v26  ;;  %v6750_v35 = vcombine.high %v1547_v32, %v1563_v20 }
 0x27e   : > { %v1577_v39 = vpack.i.b16 %v6738_v13, %v6736_v42  ;;  %v1589_v54 = vpack.i.b16 %v6742_v48, %v6740_v23  ;;  %v1578_v0 = vshrl.u32 %v6736_v42, 16  ;;  %v1579_v1 = vshrl.u32 %v6738_v13, 16 }
 0x27f   : > { %v1595_v51 = vpack.i.b16 %v6746_v11, %v6744_v33  ;;  %v1583_v63 = vpack.i.b16 %v6750_v35, %v6748_v58  ;;  %v1584_v3 = vshrl.u32 %v6748_v58, 16  ;;  %v1585_v44 = vshrl.u32 %v6750_v35, 16  ;;  %1099 = vrot.lane.b32.xlu1 %v6490_v8, %s6216_s8 }
 0x280   : > { %v6766_v4 = vpack.i.b16 %v1579_v1, %v1578_v0  ;;  %v1590_v55 = vshrl.u32 %v6740_v23, 16  ;;  %v1591_v50 = vshrl.u32 %v6742_v48, 16  ;;  %v1596_v60 = vshrl.u32 %v6744_v33, 16  ;;  %2431 = vxpose.xlu0.c.b16.start.end [1/1] (short) (narrow) %v2189_v40, 16 }
 0x281   : > { %v6771_v7 = vpack.i.b16 %v1585_v44, %v1584_v3  ;;  %v1597_v9 = vshrl.u32 %v6746_v11, 16 }
 0x282   : > { %v6774_v17 = vpack.i.b16 %v1591_v50, %v1590_v55 }
 0x283   : > { %v6776_v19 = vpack.i.b16 %v1597_v9, %v1596_v60  ;;  %1101 = vrot.lane.b32.xlu1 %v6492_v10, %s6216_s8 }
 0x287   : > { %1107 = vrot.lane.b32.xlu1 %v6492_v10, %s6213_s5 }
 0x289   : > { %1095 = vrot.lane.b32.xlu0 %v6492_v10, %s6214_s6 }
 0x28b   : > { %1113 = vrot.lane.b32.xlu1 %v6492_v10, %s6215_s7 }
 0x28d   : > { %1105 = vrot.lane.b32.xlu0 %v6490_v8, %s6213_s5 }
 0x28f   : > { %1119 = vrot.lane.b32.xlu1 %v6492_v10, %s6217_s9 }
 0x291   : > { %1111 = vrot.lane.b32.xlu0 %v6490_v8, %s6215_s7 }
 0x293   : > { %1125 = vrot.lane.b32.xlu1 %v6492_v10, %s6218_s10 }
 0x295   : > { %1117 = vrot.lane.b32.xlu0 %v6490_v8, %s6217_s9 }
 0x297   : > { %1131 = vrot.lane.b32.xlu1 %v6492_v10, %s6219_s11 }
 0x299   : > { %1123 = vrot.lane.b32.xlu0 %v6490_v8, %s6218_s10 }
 0x29d   : > { %1129 = vrot.lane.b32.xlu0 %v6490_v8, %s6219_s11 }
 0x2c5   : > { %v2263_v14 = vpop.trf.xlu1  ;;  %v2199_v5 = vpop.trf.xlu0 }
 0x2c6   : > { %v2447_v43 = vcombine.low %v2199_v5, %v2263_v14 }
 0x2c8   : > { %v2454_v20 = vrot.slane %v2447_v43, %v6438_v59 }
 0x2c9   : > { %v2295_v22 = vpop.trf.xlu1 }
 0x2ca   : > { %v2231_v24 = vpop.trf.xlu0 }
 0x2cb   : > { %v2455_v62 = vcombine.low %v2231_v24, %v2295_v22 }
 0x2cd   : > { %v2327_v6 = vpop.trf.xlu1  ;;  %v2462_v12 = vrot.slane %v2455_v62, %v6438_v59 }
 0x2ce   : > { %v2247_v56 = vpop.trf.xlu0 }
 0x2cf   : > { %v2479_v37 = vcombine.low %v2454_v20, %v2462_v12  ;;  %v2480_v57 = vcombine.high %v2454_v20, %v2462_v12 }
 0x2d1   : > { %v2359_v28 = vpop.trf.xlu1  ;;  %v2487_v9 = vrot.slane %v2479_v37, %v6453_v16  ;;  %v2494_v14 = vrot.slane %v2480_v57, %v6453_v16 }
 0x2d2   : > { %v2279_v52 = vpop.trf.xlu0 }
 0x2d5   : > { %v2391_v36 = vpop.trf.xlu1 }
 0x2d6   : > { %v2311_v25 = vpop.trf.xlu0  ;;  %v2463_v30 = vcombine.low %v2327_v6, %v2391_v36 }
 0x2d7   : > { %v2523_v29 = vcombine.low %v2247_v56, %v2311_v25 }
 0x2d8   : > { %v2470_v47 = vrot.slane %v2463_v30, %v6438_v59 }
 0x2d9   : > { %v2215_v53 = vpop.trf.xlu1  ;;  %v2530_v31 = vrot.slane %v2523_v29, %v6438_v59 }
 0x2da   : > { %v2343_v34 = vpop.trf.xlu0  ;;  %v2515_v27 = vcombine.low %v2215_v53, %v2279_v52 }
 0x2dc   : > { %v2522_v15 = vrot.slane %v2515_v27, %v6438_v59 }
 0x2dd   : > { %v2423_v38 = vpop.trf.xlu1 }
 0x2de   : > { %v2375_v61 = vpop.trf.xlu0  ;;  %v2471_v41 = vcombine.low %v2359_v28, %v2423_v38  ;;  %v2547_v40 = vcombine.low %v2522_v15, %v2530_v31  ;;  %v2548_v0 = vcombine.high %v2522_v15, %v2530_v31 }
 0x2e0   : > { %v2478_v2 = vrot.slane %v2471_v41, %v6438_v59  ;;  %v2555_v5 = vrot.slane %v2547_v40, %v6453_v16  ;;  %v2562_v22 = vrot.slane %v2548_v0, %v6453_v16 }
 0x2e2   : > { %v2407_v18 = vpop.trf.xlu0  ;;  %v2495_v46 = vcombine.low %v2470_v47, %v2478_v2  ;;  %v2496_v32 = vcombine.high %v2470_v47, %v2478_v2 }
 0x2e3   : > { %v2531_v26 = vcombine.low %v2343_v34, %v2407_v18 }
 0x2e4   : > { %v2503_v44 = vrot.slane %v2495_v46, %v6453_v16  ;;  %v2510_v55 = vrot.slane %v2496_v32, %v6453_v16 }
 0x2e5   : > { %v2538_v1 = vrot.slane %v2531_v26, %v6438_v59 }
 0x2e6   : > { %v2439_v49 = vpop.trf.xlu0  ;;  %v2511_v28 = vcombine.low %v2487_v9, %v2503_v44  ;;  %v2513_v36 = vcombine.low %v2494_v14, %v2510_v55  ;;  %v6824_v30 = vcombine.high %v2494_v14, %v2510_v55  ;;  %v2512_v23 = vcombine.high %v2487_v9, %v2503_v44 }
 0x2e7   : > { %v2539_v45 = vcombine.low %v2375_v61, %v2439_v49 }
 0x2e8   : > { %v2587_v62 = vshrl.u32 %v2511_v28, 16  ;;  %v2603_v20 = vshrl.u32 %v2513_v36, 16  ;;  %v2611_v9 = vshrl.u32 %v6824_v30, 16 }
 0x2e9   : > { %v2546_v3 = vrot.slane %v2539_v45, %v6438_v59 }
 0x2eb   : > { %v2563_v50 = vcombine.low %v2538_v1, %v2546_v3  ;;  %v2564_v60 = vcombine.high %v2538_v1, %v2546_v3 }
 0x2ed   : > { %v2571_v24 = vrot.slane %v2563_v50, %v6453_v16  ;;  %v2578_v6 = vrot.slane %v2564_v60, %v6453_v16  ;;  %v6818_v56 = vpop.permute.xlu1 %1093 }
 0x2ef   : > { %v2579_v52 = vcombine.low %v2555_v5, %v2571_v24  ;;  %v2581_v25 = vcombine.low %v2562_v22, %v2578_v6  ;;  %v6822_v41 = vcombine.high %v2562_v22, %v2578_v6  ;;  %v2580_v29 = vcombine.high %v2555_v5, %v2571_v24 }
 0x2f1   : > { %v6820_v53 = vpop.permute.xlu1 %1099  ;;  %v2585_v34 = vpack.i.b16 %v2579_v52, %v2511_v28  ;;  %v2601_v38 = vpack.i.b16 %v2581_v25, %v2513_v36  ;;  %v2588_v61 = vshrl.u32 %v2579_v52, 16  ;;  %v2609_v18 = vpack.i.b16 %v6822_v41, %v6824_v30 }
 0x2f2   : > { %v2593_v48 = vpack.i.b16 %v2580_v29, %v2512_v23  ;;  %v2596_v2 = vshrl.u32 %v2580_v29, 16  ;;  %v2604_v11 = vshrl.u32 %v2581_v25, 16  ;;  %v1135_v49 = vcombine.low %v6490_v8, %v6820_v53 }
 0x2f3   : > { %5791 = vmatpush3.bf16.msra.mxu1 %v2585_v34  ;;  %5815 = vmatpush3.bf16.msra.mxu0 %v2601_v38  ;;  %v2589_v43 = vpack.i.b16 %v2588_v61, %v2587_v62  ;;  %v1136_v0 = vcombine.high %v6490_v8, %v6820_v53  ;;  %v2612_v1 = vshrl.u32 %v6822_v41, 16 }
 0x2f4   : > { %5796 = vmatprep.subr.bf16.mxu1 %v6211_v21  ;;  %5826 = vmatprep.subr.bf16.mxu0 %v6211_v21  ;;  %v2605_v58 = vpack.i.b16 %v2604_v11, %v2603_v20  ;;  %v1143_v45 = vrot.slane %v1135_v49, %v6438_v59 }
 0x2f5   : > { %v6828_v27 = vpop.permute.xlu1 %1101  ;;  %v1150_v28 = vrot.slane %v1136_v0, %v6438_v59 }
 0x2f6   : > { %5793 = vmatmul.mubr.msk.bf16.vlgmr.msra.gmra.mrb[4].mxu1 %vm2615_vm1, %v1577_v39  ;;  %5817 = vmatmul.mubr.msk.bf16.vlgmr.msra.gmra.mrb[4].mxu0 %vm2615_vm1, %v1589_v54  ;;  %v1271_v62 = vcombine.low %v6492_v10, %v6828_v27 }
 0x2f7   : > { %5797 = vmatpush3.bf16.msra.mxu1 %v2589_v43  ;;  %5827 = vmatpush3.bf16.msra.mxu0 %v2609_v18 }
 0x2f8   : > { %5798 = vmatprep.mubr.msk.bf16.mxu1 %vm6212_vm0, %v6211_v21  ;;  %5802 = vmatprep.subr.bf16.mxu1 %v6211_v21 }
 0x2f9   : > { %5828 = vmatprep.mubr.msk.bf16.mxu0 %vm6212_vm0, %v6211_v21  ;;  %5838 = vmatprep.subr.bf16.mxu0 %v6211_v21  ;;  %v6846_v42 = vpop.permute.xlu1 %1107 }
 0x2fb   : > { %v6848_v13 = vpop.permute.xlu0 %1095 }
 0x2fc   : > { %v1287_v53 = vcombine.low %v6848_v13, %v6846_v42 }
 0x2fd   : > { %v6858_v54 = vpop.permute.xlu1 %1113 }
 0x2fe   : > { %5799 = vmatmul.mubr.msk.bf16.vlgmr.msra.gmra.mrb[8].mxu1 %vm2615_vm1, %v6766_v4  ;;  %5829 = vmatmul.mubr.msk.bf16.vlgmr.msra.gmra.mrb[8].mxu0 %vm2615_vm1, %v1595_v51  ;;  %v2595_v4 = vshrl.u32 %v2512_v23, 16 }
 0x2ff   : > { %5803 = vmatpush3.bf16.msra.mxu1 %v2593_v48  ;;  %v1106_v39 = vpop.permute.xlu0 %1105  ;;  %5804 = vmatprep.mubr.msk.bf16.mxu1 %vm6212_vm0, %v6211_v21 }
 0x300   : > { %5808 = vmatprep.subr.bf16.mxu1 %v6211_v21  ;;  %5840 = vmatprep.mubr.msk.bf16.mxu0 %vm6212_vm0, %v6211_v21  ;;  %v2597_v47 = vpack.i.b16 %v2596_v2, %v2595_v4  ;;  %v1151_v51 = vcombine.low %v6818_v56, %v1106_v39  ;;  %v1152_v37 = vcombine.high %v6818_v56, %v1106_v39 }
 0x301   : > { %v6863_v15 = vpop.permute.xlu1 %1119  ;;  %v2613_v56 = vpack.i.b16 %v2612_v1, %v2611_v9 }
 0x302   : > { %v1159_v35 = vrot.slane %v1151_v51, %v6438_v59  ;;  %v1166_v14 = vrot.slane %v1152_v37, %v6438_v59 }
 0x303   : > { %v1112_v12 = vpop.permute.xlu0 %1111 }
 0x304   : > { %v1200_v5 = vcombine.high %v1143_v45, %v1159_v35  ;;  %v1215_v38 = vcombine.low %v1150_v28, %v1166_v14  ;;  %v1216_v4 = vcombine.high %v1150_v28, %v1166_v14 }
 0x305   : > { %v6875_v31 = vpop.permute.xlu1 %1125 }
 0x306   : > { %5805 = vmatmul.mubr.msk.bf16.vlgmr.msra.gmra.mrb[12].mxu1 %vm2615_vm1, %v1583_v63  ;;  %v1303_v34 = vcombine.low %v6858_v54, %v6875_v31 }
 0x307   : > { %5809 = vmatpush3.bf16.msra.mxu1 %v2597_v47  ;;  %v1118_v33 = vpop.permute.xlu0 %1117  ;;  %5810 = vmatprep.mubr.msk.bf16.mxu1 %vm6212_vm0, %v6211_v21  ;;  %v1223_v47 = vrot.slane %v1215_v38, %v6453_v16 }
 0x308   : > { %5820 = vmatprep.subr.bf16.mxu1 %v6211_v21  ;;  %v1311_v2 = vrot.slane %v1303_v34, %v6438_v59 }
 0x309   : > { %v1132_v3 = vpop.permute.xlu1 %1131 }
 0x30a   : > { %v1319_v8 = vcombine.low %v6863_v15, %v1132_v3  ;;  %v1320_v11 = vcombine.high %v6863_v15, %v1132_v3  ;;  %v1230_v15 = vrot.slane %v1216_v4, %v6453_v16 }
 0x30b   : > { %v1124_v26 = vpop.permute.xlu0 %1123 }
 0x30c   : > { %v1167_v63 = vcombine.low %v1112_v12, %v1124_v26  ;;  %v1168_v46 = vcombine.high %v1112_v12, %v1124_v26  ;;  %v1327_v30 = vrot.slane %v1319_v8, %v6438_v59  ;;  %v1295_v12 = vrot.slane %v1287_v53, %v6438_v59 }
 0x30e   : > { %5811 = vmatmul.mubr.msk.bf16.vlgmr.msra.gmra.mrb[16].mxu1 %vm2615_vm1, %v6771_v7  ;;  %v1199_v7 = vcombine.low %v1143_v45, %v1159_v35  ;;  %v1175_v44 = vrot.slane %v1167_v63, %v6438_v59  ;;  %v1182_v60 = vrot.slane %v1168_v46, %v6438_v59  ;;  %v1367_v51 = vcombine.low %v1311_v2, %v1327_v30 }
 0x30f   : > { %5821 = vmatpush3.bf16.msra.mxu1 %v2605_v58  ;;  %v1130_v32 = vpop.permute.xlu0 %1129  ;;  %5822 = vmatprep.mubr.msk.bf16.mxu1 %vm6212_vm0, %v6211_v21  ;;  %v1304_v63 = vcombine.high %v6858_v54, %v6875_v31  ;;  %v1288_v46 = vcombine.high %v6848_v13, %v6846_v42  ;;  %v1334_v45 = vrot.slane %v1320_v11, %v6438_v59 }
 0x310   : > { %v1183_v57 = vcombine.low %v1118_v33, %v1130_v32  ;;  %v1184_v40 = vcombine.high %v1118_v33, %v1130_v32  ;;  %5832 = vmatprep.subr.bf16.mxu1 %v6211_v21  ;;  %v1207_v52 = vrot.slane %v1199_v7, %v6453_v16  ;;  %v1279_v33 = vrot.slane %v1271_v62, %v6438_v59 }
 0x311   : > { %v1368_v37 = vcombine.high %v1311_v2, %v1327_v30  ;;  %v1318_v1 = vrot.slane %v1304_v63, %v6438_v59  ;;  %v1302_v42 = vrot.slane %v1288_v46, %v6438_v59 }
 0x312   : > { %v1191_v55 = vrot.slane %v1183_v57, %v6438_v59  ;;  %v1198_v50 = vrot.slane %v1184_v40, %v6438_v59  ;;  %v1335_v32 = vcombine.low %v1279_v33, %v1295_v12  ;;  %v1375_v57 = vrot.slane %v1367_v51, %v6453_v16 }
 0x313   : > { %v1336_v7 = vcombine.high %v1279_v33, %v1295_v12  ;;  %v1382_v3 = vrot.slane %v1368_v37, %v6453_v16 }
 0x314   : > { %v1231_v22 = vcombine.low %v1175_v44, %v1191_v55  ;;  %v1232_v24 = vcombine.high %v1175_v44, %v1191_v55  ;;  %v1247_v6 = vcombine.low %v1182_v60, %v1198_v50  ;;  %v1248_v43 = vcombine.high %v1182_v60, %v1198_v50 }
 0x315   : > { %v1343_v13 = vrot.slane %v1335_v32, %v6453_v16  ;;  %v1350_v9 = vrot.slane %v1336_v7, %v6453_v16 }
 0x316   : > { %5823 = vmatmul.mubr.msk.bf16.vlgmr.msra.gmra.mrb[20].mxu1 %vm2615_vm1, %v6774_v17  ;;  %v1239_v36 = vrot.slane %v1231_v22, %v6453_v16  ;;  %v1246_v25 = vrot.slane %v1232_v24, %v6453_v16  ;;  %v1214_v17 = vrot.slane %v1200_v5, %v6453_v16  ;;  %v1255_v18 = vrot.slane %v1247_v6, %v6453_v16 }
 0x317   : > { %5833 = vmatpush3.bf16.msra.mxu1 %v2613_v56  ;;  %5834 = vmatprep.mubr.msk.bf16.mxu1 %vm6212_vm0, %v6211_v21  ;;  %v1262_v26 = vrot.slane %v1248_v43, %v6453_v16  ;;  %v1400_v50 = vcombine.high %v1343_v13, %v1375_v57  ;;  %v1399_v60 = vcombine.low %v1343_v13, %v1375_v57 }
 0x318   : > { %v1264_v61 = vcombine.high %v1207_v52, %v1239_v36  ;;  %v1263_v41 = vcombine.low %v1207_v52, %v1239_v36  ;;  %5844 = vmatprep.subr.bf16.mxu1 %v6211_v21  ;;  %v1266_v48 = vcombine.high %v1214_v17, %v1246_v25  ;;  %v1265_v39 = vcombine.low %v1214_v17, %v1246_v25 }
 0x319   : > { %v1268_v58 = vcombine.high %v1223_v47, %v1255_v18  ;;  %v1267_v35 = vcombine.low %v1223_v47, %v1255_v18  ;;  %v1270_v40 = vcombine.high %v1230_v15, %v1262_v26  ;;  %v1269_v0 = vcombine.low %v1230_v15, %v1262_v26 }
 0x31a   : > { %v3153_v29 = vpack.c.bf16 %v1264_v61, %v1264_v61  ;;  %v3152_v23 = vpack.c.bf16 %v1263_v41, %v1263_v41  ;;  %v3155_v20 = vpack.c.bf16 %v1266_v48, %v1266_v48  ;;  %v3154_v49 = vpack.c.bf16 %v1265_v39, %v1265_v39 }
 0x31b   : > { %v3157_v54 = vpack.c.bf16 %v1268_v58, %v1268_v58  ;;  %v3156_v31 = vpack.c.bf16 %v1267_v35, %v1267_v35  ;;  %v3159_v44 = vpack.c.bf16 %v1270_v40, %v1270_v40  ;;  %v3158_v55 = vpack.c.bf16 %v1269_v0, %v1269_v0 }
 0x31c   : > { %3184 = vxpose.xlu0.c.b16.start.end [1/1] (short) (narrow) %v3153_v29, 16  ;;  %3168 = vxpose.xlu1.c.b16.start.end [1/1] (short) (narrow) %v3152_v23, 16  ;;  %v1384_v5 = vcombine.high %v1318_v1, %v1334_v45  ;;  %v3161_v24 = vpack.c.bf16 %v1400_v50, %v1400_v50  ;;  %v3160_v8 = vpack.c.bf16 %v1399_v60, %v1399_v60 }
 0x31d   : > { %v1402_v6 = vcombine.high %v1350_v9, %v1382_v3  ;;  %v1401_v56 = vcombine.low %v1350_v9, %v1382_v3 }
 0x31e   : > { %5835 = vmatmul.mubr.msk.bf16.vlgmr.msra.gmra.mrb[24].mxu1 %vm2615_vm1, %v6776_v19  ;;  %v1272_v19 = vcombine.high %v6492_v10, %v6828_v27  ;;  %v1383_v27 = vcombine.low %v1318_v1, %v1334_v45  ;;  %v1398_v36 = vrot.slane %v1384_v5, %v6453_v16 }
 0x31f   : > { %5846 = vmatprep.mubr.msk.bf16.mxu1 %vm6212_vm0, %v6211_v21  ;;  %v3163_v25 = vpack.c.bf16 %v1402_v6, %v1402_v6  ;;  %v3162_v53 = vpack.c.bf16 %v1401_v56, %v1401_v56 }
 0x320   : > { %3216 = vxpose.xlu0.c.b16.start.end [1/1] (short) (narrow) %v3155_v20, 16  ;;  %3200 = vxpose.xlu1.c.b16.start.end [1/1] (short) (narrow) %v3154_v49, 16  ;;  %v1286_v10 = vrot.slane %v1272_v19, %v6438_v59  ;;  %v1391_v22 = vrot.slane %v1383_v27, %v6453_v16 }
 0x322   : > { %v1351_v14 = vcombine.low %v1286_v10, %v1302_v42  ;;  %v1352_v52 = vcombine.high %v1286_v10, %v1302_v42 }
 0x324   : > { %3248 = vxpose.xlu0.c.b16.start.end [1/1] (short) (narrow) %v3157_v54, 16  ;;  %3232 = vxpose.xlu1.c.b16.start.end [1/1] (short) (narrow) %v3156_v31, 16  ;;  %v1359_v28 = vrot.slane %v1351_v14, %v6453_v16  ;;  %v1366_v61 = vrot.slane %v1352_v52, %v6453_v16 }
 0x326   : > { %v1404_v34 = vcombine.high %v1359_v28, %v1391_v22  ;;  %v1403_v38 = vcombine.low %v1359_v28, %v1391_v22  ;;  %v1406_v62 = vcombine.high %v1366_v61, %v1398_v36  ;;  %v1405_v30 = vcombine.low %v1366_v61, %v1398_v36 }
 0x328   : > { %3280 = vxpose.xlu0.c.b16.start.end [1/1] (short) (narrow) %v3159_v44, 16  ;;  %3264 = vxpose.xlu1.c.b16.start.end [1/1] (short) (narrow) %v3158_v55, 16  ;;  %v3165_v41 = vpack.c.bf16 %v1404_v34, %v1404_v34  ;;  %v3164_v17 = vpack.c.bf16 %v1403_v38, %v1403_v38  ;;  %v3167_v43 = vpack.c.bf16 %v1406_v62, %v1406_v62 }
 0x329   : > { %v3166_v18 = vpack.c.bf16 %v1405_v30, %v1405_v30 }
 0x32c   : > { %3312 = vxpose.xlu0.c.b16.start.end [1/1] (short) (narrow) %v3161_v24, 16  ;;  %3296 = vxpose.xlu1.c.b16.start.end [1/1] (short) (narrow) %v3160_v8, 16 }
 0x330   : > { %3344 = vxpose.xlu0.c.b16.start.end [1/1] (short) (narrow) %v3163_v25, 16  ;;  %3328 = vxpose.xlu1.c.b16.start.end [1/1] (short) (narrow) %v3162_v53, 16 }
 0x334   : > { %3376 = vxpose.xlu0.c.b16.start.end [1/1] (short) (narrow) %v3165_v41, 16  ;;  %3360 = vxpose.xlu1.c.b16.start.end [1/1] (short) (narrow) %v3164_v17, 16 }
 0x338   : > { %3408 = vxpose.xlu0.c.b16.start.end [1/1] (short) (narrow) %v3167_v43, 16  ;;  %3392 = vxpose.xlu1.c.b16.start.end [1/1] (short) (narrow) %v3166_v18, 16 }
 0x382   : > { %v3192_v29 = vpop.trf.xlu0  ;;  %v3176_v23 = vpop.trf.xlu1 }
 0x386   : > { %v3224_v48 = vpop.trf.xlu0  ;;  %v3208_v39 = vpop.trf.xlu1 }
 0x38a   : > { %v3256_v2 = vpop.trf.xlu0  ;;  %v3240_v12 = vpop.trf.xlu1 }
 0x38b   : > { %v3561_v4 = vcombine.high %v3192_v29, %v3256_v2  ;;  %v3425_v47 = vcombine.high %v3176_v23, %v3240_v12  ;;  %v3560_v57 = vcombine.low %v3192_v29, %v3256_v2  ;;  %v3424_v0 = vcombine.low %v3176_v23, %v3240_v12 }
 0x38d   : > { %v6943_v20 = vrot.slane %v3561_v4, %v6438_v59  ;;  %v6952_v35 = vrot.slane %v3425_v47, %v6438_v59  ;;  %v3568_v7 = vrot.slane %v3560_v57, %v6438_v59  ;;  %v3432_v5 = vrot.slane %v3424_v0, %v6438_v59 }
 0x38e   : > { %v3288_v33 = vpop.trf.xlu0  ;;  %v3272_v11 = vpop.trf.xlu1 }
 0x38f   : > { %v3577_v51 = vcombine.high %v3224_v48, %v3288_v33  ;;  %v3441_v26 = vcombine.high %v3208_v39, %v3272_v11  ;;  %v3576_v37 = vcombine.low %v3224_v48, %v3288_v33  ;;  %v3440_v54 = vcombine.low %v3208_v39, %v3272_v11 }
 0x391   : > { %v6946_v49 = vrot.slane %v3577_v51, %v6438_v59  ;;  %v6949_v58 = vrot.slane %v3441_v26, %v6438_v59  ;;  %v3584_v1 = vrot.slane %v3576_v37, %v6438_v59  ;;  %v3448_v10 = vrot.slane %v3440_v54, %v6438_v59 }
 0x392   : > { %v3320_v63 = vpop.trf.xlu0  ;;  %v3304_v46 = vpop.trf.xlu1 }
 0x393   : > { %v3641_v15 = vcombine.high %v6943_v20, %v6946_v49  ;;  %v3505_v32 = vcombine.high %v6952_v35, %v6949_v58  ;;  %v3624_v22 = vcombine.low %v3568_v7, %v3584_v1  ;;  %v3488_v36 = vcombine.low %v3432_v5, %v3448_v10 }
 0x394   : > { %v3625_v30 = vcombine.high %v3568_v7, %v3584_v1  ;;  %v3489_v43 = vcombine.high %v3432_v5, %v3448_v10  ;;  %v3504_v10 = vcombine.low %v6952_v35, %v6949_v58 }
 0x395   : > { %v3632_v18 = vrot.slane %v3624_v22, %v6453_v16  ;;  %v3496_v23 = vrot.slane %v3488_v36, %v6453_v16  ;;  %v3655_v7 = vrot.slane %v3641_v15, %v6453_v16 }
 0x396   : > { %v3352_v19 = vpop.trf.xlu0  ;;  %v3336_v45 = vpop.trf.xlu1  ;;  %v3503_v26 = vrot.slane %v3489_v43, %v6453_v16  ;;  %v3512_v5 = vrot.slane %v3504_v10, %v6453_v16 }
 0x39a   : > { %v3384_v31 = vpop.trf.xlu0  ;;  %v3368_v40 = vpop.trf.xlu1 }
 0x39b   : > { %v3592_v42 = vcombine.low %v3320_v63, %v3384_v31  ;;  %v3593_v13 = vcombine.high %v3320_v63, %v3384_v31  ;;  %v3456_v27 = vcombine.low %v3304_v46, %v3368_v40  ;;  %v3457_v3 = vcombine.high %v3304_v46, %v3368_v40 }
 0x39c   : > { %v3639_v63 = vrot.slane %v3625_v30, %v6453_v16  ;;  %v3519_v40 = vrot.slane %v3505_v32, %v6453_v16 }
 0x39d   : > { %v3600_v24 = vrot.slane %v3592_v42, %v6438_v59  ;;  %v3607_v8 = vrot.slane %v3593_v13, %v6438_v59  ;;  %v3464_v25 = vrot.slane %v3456_v27, %v6438_v59  ;;  %v3471_v53 = vrot.slane %v3457_v3, %v6438_v59 }
 0x39e   : > { %v3416_v44 = vpop.trf.xlu0  ;;  %v3400_v55 = vpop.trf.xlu1  ;;  %v3640_v13 = vcombine.low %v6943_v20, %v6946_v49 }
 0x39f   : > { %v3608_v50 = vcombine.low %v3352_v19, %v3416_v44  ;;  %v3609_v60 = vcombine.high %v3352_v19, %v3416_v44  ;;  %v3472_v9 = vcombine.low %v3336_v45, %v3400_v55  ;;  %v3473_v14 = vcombine.high %v3336_v45, %v3400_v55 }
 0x3a0   : > { %v3648_v35 = vrot.slane %v3640_v13, %v6453_v16 }
 0x3a1   : > { %v3616_v6 = vrot.slane %v3608_v50, %v6438_v59  ;;  %v3623_v56 = vrot.slane %v3609_v60, %v6438_v59  ;;  %v3480_v28 = vrot.slane %v3472_v9, %v6438_v59  ;;  %v3487_v52 = vrot.slane %v3473_v14, %v6438_v59 }
 0x3a3   : > { %v3656_v34 = vcombine.low %v3600_v24, %v3616_v6  ;;  %v3657_v38 = vcombine.high %v3600_v24, %v3616_v6  ;;  %v3673_v61 = vcombine.high %v3607_v8, %v3623_v56  ;;  %v3520_v41 = vcombine.low %v3464_v25, %v3480_v28 }
 0x3a4   : > { %v3521_v17 = vcombine.high %v3464_v25, %v3480_v28  ;;  %v3537_v62 = vcombine.high %v3471_v53, %v3487_v52  ;;  %v3672_v11 = vcombine.low %v3607_v8, %v3623_v56  ;;  %v3536_v46 = vcombine.low %v3471_v53, %v3487_v52 }
 0x3a5   : > { %v3664_v29 = vrot.slane %v3656_v34, %v6453_v16  ;;  %v3528_v48 = vrot.slane %v3520_v41, %v6453_v16  ;;  %v3671_v12 = vrot.slane %v3657_v38, %v6453_v16  ;;  %v3687_v57 = vrot.slane %v3673_v61, %v6453_v16 }
 0x3a6   : > { %v3535_v2 = vrot.slane %v3521_v17, %v6453_v16  ;;  %v3551_v19 = vrot.slane %v3537_v62, %v6453_v16  ;;  %v3680_v27 = vrot.slane %v3672_v11, %v6453_v16  ;;  %v3544_v3 = vrot.slane %v3536_v46, %v6453_v16 }
 0x3a7   : > { %v3688_v39 = vcombine.low %v3632_v18, %v3664_v29  ;;  %v3552_v4 = vcombine.low %v3496_v23, %v3528_v48  ;;  %v3553_v47 = vcombine.high %v3496_v23, %v3528_v48  ;;  %v3689_v33 = vcombine.high %v3632_v18, %v3664_v29 }
 0x3a8   : > { %v3554_v54 = vcombine.low %v3503_v26, %v3535_v2  ;;  %v3690_v31 = vcombine.low %v3639_v63, %v3671_v12  ;;  %v3691_v44 = vcombine.high %v3639_v63, %v3671_v12  ;;  %v6991_v55 = vcombine.low %v3519_v40, %v3551_v19 }
 0x3a9   : > { %v3701_v51 = vshrl.u32 %v3688_v39, 16  ;;  %v3698_v45 = vpack.i.b16 %v3688_v39, %v3552_v4  ;;  %v3700_v37 = vshrl.u32 %v3552_v4, 16  ;;  %v3708_v1 = vshrl.u32 %v3553_v47, 16 }
 0x3aa   : > { %v3709_v42 = vshrl.u32 %v3689_v33, 16  ;;  %v3706_v32 = vpack.i.b16 %v3689_v33, %v3553_v47  ;;  %v3716_v50 = vshrl.u32 %v3554_v54, 16  ;;  %v3717_v60 = vshrl.u32 %v3690_v31, 16 }
 0x3ab   : > { %3760 = vxpose.xlu1.c.b16.start.end [1/1] (short) (narrow) %v3698_v45, 16  ;;  %v3702_v0 = vpack.i.b16 %v3701_v51, %v3700_v37  ;;  %v3555_v9 = vcombine.high %v3503_v26, %v3535_v2  ;;  %v6993_v14 = vcombine.low %v3655_v7, %v3687_v57  ;;  %v3748_v49 = vshrl.u32 %v6991_v55, 16 }
 0x3ac   : > { %v3710_v20 = vpack.i.b16 %v3709_v42, %v3708_v1  ;;  %v6996_v15 = vcombine.high %v3519_v40, %v3551_v19  ;;  %v6998_v58 = vcombine.high %v3655_v7, %v3687_v57  ;;  %v3714_v8 = vpack.i.b16 %v3690_v31, %v3554_v54 }
 0x3ad   : > { %3776 = vxpose.xlu0.c.b16.start.end [1/1] (short) (narrow) %v3702_v0, 16  ;;  %v3746_v22 = vpack.i.b16 %v6993_v14, %v6991_v55  ;;  %v3749_v24 = vshrl.u32 %v6993_v14, 16  ;;  %v3724_v52 = vshrl.u32 %v3555_v9, 16  ;;  %v3725_v36 = vshrl.u32 %v3691_v44, 16 }
 0x3ae   : > { %v3754_v6 = vpack.i.b16 %v6998_v58, %v6996_v15  ;;  %v3756_v56 = vshrl.u32 %v6996_v15, 16  ;;  %v3757_v28 = vshrl.u32 %v6998_v58, 16  ;;  %v3718_v53 = vpack.i.b16 %v3717_v60, %v3716_v50 }
 0x3af   : > { %3792 = vxpose.xlu1.c.b16.start.end [1/1] (short) (narrow) %v3706_v32, 16  ;;  %v7009_v25 = vpack.i.b16 %v3749_v24, %v3748_v49  ;;  %v3556_v34 = vcombine.low %v3512_v5, %v3544_v3  ;;  %v3692_v38 = vcombine.low %v3648_v35, %v3680_v27  ;;  %v3722_v41 = vpack.i.b16 %v3691_v44, %v3555_v9 }
 0x3b0   : > { %v7011_v61 = vpack.i.b16 %v3757_v28, %v3756_v56  ;;  %v3726_v17 = vpack.i.b16 %v3725_v36, %v3724_v52  ;;  %v3557_v43 = vcombine.high %v3512_v5, %v3544_v3  ;;  %v3693_v18 = vcombine.high %v3648_v35, %v3680_v27 }
 0x3b1   : > { %3808 = vxpose.xlu0.c.b16.start.end [1/1] (short) (narrow) %v3710_v20, 16  ;;  %v3732_v62 = vshrl.u32 %v3556_v34, 16  ;;  %v3733_v30 = vshrl.u32 %v3692_v38, 16  ;;  %v3730_v29 = vpack.i.b16 %v3692_v38, %v3556_v34 }
 0x3b2   : > { %v3740_v48 = vshrl.u32 %v3557_v43, 16  ;;  %v3741_v39 = vshrl.u32 %v3693_v18, 16  ;;  %v3738_v2 = vpack.i.b16 %v3693_v18, %v3557_v43 }
 0x3b3   : > { %3824 = vxpose.xlu1.c.b16.start.end [1/1] (short) (narrow) %v3714_v8, 16  ;;  %v3734_v23 = vpack.i.b16 %v3733_v30, %v3732_v62 }
 0x3b4   : > { %v3742_v12 = vpack.i.b16 %v3741_v39, %v3740_v48 }
 0x3b5   : > { %3840 = vxpose.xlu0.c.b16.start.end [1/1] (short) (narrow) %v3718_v53, 16 }
 0x3b7   : > { %3856 = vxpose.xlu1.c.b16.start.end [1/1] (short) (narrow) %v3722_v41, 16 }
 0x3b9   : > { %3872 = vxpose.xlu0.c.b16.start.end [1/1] (short) (narrow) %v3726_v17, 16 }
 0x3bb   : > { %3888 = vxpose.xlu1.c.b16.start.end [1/1] (short) (narrow) %v3730_v29, 16 }
 0x3bd   : > { %3904 = vxpose.xlu0.c.b16.start.end [1/1] (short) (narrow) %v3734_v23, 16 }
 0x3bf   : > { %3920 = vxpose.xlu1.c.b16.start.end [1/1] (short) (narrow) %v3738_v2, 16 }
 0x3c1   : > { %3936 = vxpose.xlu0.c.b16.start.end [1/1] (short) (narrow) %v3742_v12, 16 }
 0x3c9   : > { %v7013_v4 = vpop.f32.mrb[4].mxu1  ;;  %v7015_v47 = vpop.f32.mrb[4].mxu0 }
 0x3ca   : > { %v5794_v33 = vpop.f32.mrb[5].mxu1  ;;  %v5818_v11 = vpop.f32.mrb[5].mxu0  ;;  %v2968_v51 = vsel %vm2615_vm1, %v7013_v4, -inf  ;;  %v2992_v45 = vsel %vm2615_vm1, %v7015_v47, -inf }
 0x3cb   : > { %v7019_v26 = vpop.f32.mrb[6].mxu1  ;;  %v7021_v63 = vpop.f32.mrb[6].mxu0 }
 0x3cc   : > { %v5795_v46 = vpop.f32.mrb[7].mxu1  ;;  %v5819_v19 = vpop.f32.mrb[7].mxu0  ;;  %2969 = vmax.xlane.f32.xlu1 %v2968_v51  ;;  %v2995_v37 = vsel %vm2615_vm1, %v7021_v63, -inf  ;;  %v2971_v0 = vsel %vm2615_vm1, %v7019_v26, -inf }
 0x3ce   : > { %2993 = vmax.xlane.f32.xlu0 %v2992_v45 }
 0x3d0   : > { %2996 = vmax.xlane.f32.xlu1 %v2995_v37 }
 0x3d1   : > { %v7027_v57 = vpop.f32.mrb[8].mxu1  ;;  %v7029_v54 = vpop.f32.mrb[8].mxu0 }
 0x3d2   : > { %v5800_v31 = vpop.f32.mrb[9].mxu1  ;;  %v5830_v40 = vpop.f32.mrb[9].mxu0  ;;  %v2974_v1 = vsel %vm2615_vm1, %v7027_v57, -inf  ;;  %2972 = vmax.xlane.f32.xlu0 %v2971_v0  ;;  %v3004_v3 = vsel %vm2615_vm1, %v7029_v54, -inf }
 0x3d3   : > { %v7035_v42 = vpop.f32.mrb[10].mxu1  ;;  %v7037_v13 = vpop.f32.mrb[10].mxu0 }
 0x3d4   : > { %v5801_v7 = vpop.f32.mrb[11].mxu1  ;;  %v5831_v10 = vpop.f32.mrb[11].mxu0  ;;  %v2977_v27 = vsel %vm2615_vm1, %v7035_v42, -inf  ;;  %2975 = vmax.xlane.f32.xlu1 %v2974_v1  ;;  %v3007_v50 = vsel %vm2615_vm1, %v7037_v13, -inf }
 0x3d6   : > { %2978 = vmax.xlane.f32.xlu0 %v2977_v27 }
 0x3d8   : > { %3005 = vmax.xlane.f32.xlu1 %v3004_v3 }
 0x3d9   : > { %v7043_v32 = vpop.f32.mrb[12].mxu1 }
 0x3da   : > { %v5806_v44 = vpop.f32.mrb[13].mxu1  ;;  %v2980_v60 = vsel %vm2615_vm1, %v7043_v32, -inf  ;;  %3008 = vmax.xlane.f32.xlu0 %v3007_v50 }
 0x3db   : > { %v7049_v9 = vpop.f32.mrb[14].mxu1 }
 0x3dc   : > { %v5807_v20 = vpop.f32.mrb[15].mxu1  ;;  %v2983_v49 = vsel %vm2615_vm1, %v7049_v9, -inf  ;;  %2981 = vmax.xlane.f32.xlu1 %v2980_v60 }
 0x3de   : > { %2984 = vmax.xlane.f32.xlu0 %v2983_v49 }
 0x3e1   : > { %v7053_v35 = vpop.f32.mrb[16].mxu1 }
 0x3e2   : > { %v5812_v5 = vpop.f32.mrb[17].mxu1  ;;  %v2986_v24 = vsel %vm2615_vm1, %v7053_v35, -inf }
 0x3e3   : > { %v7057_v8 = vpop.f32.mrb[18].mxu1  ;;  %2987 = vmax.xlane.f32.xlu1 %v2986_v24 }
 0x3e4   : > { %v5813_v56 = vpop.f32.mrb[19].mxu1  ;;  %v2989_v28 = vsel %vm2615_vm1, %v7057_v8, -inf }
 0x3e5   : > { %2990 = vmax.xlane.f32.xlu0 %v2989_v28 }
 0x3e9   : > { %v7061_v52 = vpop.f32.mrb[20].mxu1 }
 0x3ea   : > { %v5824_v36 = vpop.f32.mrb[21].mxu1  ;;  %v2998_v53 = vsel %vm2615_vm1, %v7061_v52, -inf }
 0x3eb   : > { %v7065_v34 = vpop.f32.mrb[22].mxu1  ;;  %2999 = vmax.xlane.f32.xlu0 %v2998_v53 }
 0x3ec   : > { %v5825_v38 = vpop.f32.mrb[23].mxu1  ;;  %v3001_v41 = vsel %vm2615_vm1, %v7065_v34, -inf }
 0x3ef   : > { %3002 = vmax.xlane.f32.xlu0 %v3001_v41 }
 0x3f1   : > { %v7069_v17 = vpop.f32.mrb[24].mxu1 }
 0x3f2   : > { %v5836_v62 = vpop.f32.mrb[25].mxu1  ;;  %v3010_v30 = vsel %vm2615_vm1, %v7069_v17, -inf }
 0x3f3   : > { %v7073_v43 = vpop.f32.mrb[26].mxu1  ;;  %3011 = vmax.xlane.f32.xlu1 %v3010_v30 }
 0x3f4   : > { %v5837_v18 = vpop.f32.mrb[27].mxu1  ;;  %v3013_v29 = vsel %vm2615_vm1, %v7073_v43, -inf }
 0x3f5   : > { %3014 = vmax.xlane.f32.xlu0 %v3013_v29 }
 0x411   : > { %v3768_v23 = vpop.trf.xlu1 }
 0x413   : > { %v3784_v48 = vpop.trf.xlu0 }
 0x415   : > { %v3800_v39 = vpop.trf.xlu1 }
 0x417   : > { %v3816_v2 = vpop.trf.xlu0 }
 0x419   : > { %v3832_v12 = vpop.trf.xlu1 }
 0x41a   : > { %v4016_v33 = vcombine.low %v3768_v23, %v3832_v12 }
 0x41b   : > { %v3848_v11 = vpop.trf.xlu0 }
 0x41c   : > { %v4084_v51 = vcombine.low %v3784_v48, %v3848_v11  ;;  %v7078_v19 = vrot.slane %v4016_v33, %v6438_v59 }
 0x41d   : > { %v3864_v46 = vpop.trf.xlu1 }
 0x41e   : > { %v4024_v45 = vcombine.low %v3800_v39, %v3864_v46  ;;  %v7084_v31 = vrot.slane %v4084_v51, %v6438_v59 }
 0x41f   : > { %v3880_v37 = vpop.trf.xlu0 }
 0x420   : > { %3952 = vxpose.xlu1.c.b16.start.end [1/1] (short) (narrow) %v3746_v22, 16  ;;  %v7087_v40 = vrot.slane %v4024_v45, %v6438_v59  ;;  %v4092_v0 = vcombine.low %v3816_v2, %v3880_v37 }
 0x421   : > { %v7101_v22 = vpop.trf.xlu1 }
 0x422   : > { %3968 = vxpose.xlu0.c.b16.start.end [1/1] (short) (narrow) %v7009_v25, 16  ;;  %v4048_v1 = vcombine.low %v7078_v19, %v7087_v40  ;;  %v4049_v7 = vcombine.high %v7078_v19, %v7087_v40  ;;  %v7095_v10 = vrot.slane %v4092_v0, %v6438_v59 }
 0x423   : > { %v7103_v27 = vpop.trf.xlu0 }
 0x424   : > { %v4116_v55 = vcombine.low %v7084_v31, %v7095_v10  ;;  %v4117_v14 = vcombine.high %v7084_v31, %v7095_v10 }
 0x425   : > { %v7105_v25 = vpop.trf.xlu1 }
 0x427   : > { %v7107_v3 = vpop.trf.xlu0 }
 0x459   : > { %v2970_v44 = vpop.xlane.xlu1 %2969 }
 0x45a   : > { %v3016_v50 = vsub.f32 %v7013_v4, %v2970_v44 }
 0x45b   : > { %v2994_v60 = vpop.xlane.xlu0 %2993 }
 0x45c   : > { %v3032_v20 = vmul.f32 1.442695, %v3016_v50  ;;  %v3024_v49 = vsub.f32 %v7015_v47, %v2994_v60 }
 0x45d   : > { %v2997_v5 = vpop.xlane.xlu1 %2996 }
 0x45e   : > { %6047 = vpow2.f32 %v3032_v20  ;;  %v3048_v24 = vmul.f32 1.442695, %v3024_v49  ;;  %v3025_v56 = vsub.f32 %v7021_v63, %v2997_v5 }
 0x45f   : > { %v2973_v28 = vpop.xlane.xlu0 %2972 }
 0x460   : > { %6049 = vpow2.f32 %v3048_v24  ;;  %v3017_v36 = vsub.f32 %v7019_v26, %v2973_v28  ;;  %v3050_v53 = vmul.f32 1.442695, %v3025_v56 }
 0x461   : > { %v2976_v38 = vpop.xlane.xlu1 %2975 }
 0x462   : > { %v3034_v41 = vmul.f32 1.442695, %v3017_v36  ;;  %v3018_v62 = vsub.f32 %v7027_v57, %v2976_v38 }
 0x463   : > { %v2979_v30 = vpop.xlane.xlu0 %2978 }
 0x464   : > { %6051 = vpow2.f32 %v3034_v41  ;;  %v3036_v4 = vmul.f32 1.442695, %v3018_v62  ;;  %v3019_v18 = vsub.f32 %v7035_v42, %v2979_v30 }
 0x465   : > { %6053 = vpow2.f32 %v3050_v53  ;;  %v3006_v47 = vpop.xlane.xlu1 %3005 }
 0x466   : > { %6055 = vpow2.f32 %v3036_v4  ;;  %v3038_v29 = vmul.f32 1.442695, %v3019_v18  ;;  %v3028_v63 = vsub.f32 %v7029_v54, %v3006_v47 }
 0x467   : > { %v3009_v23 = vpop.xlane.xlu0 %3008 }
 0x468   : > { %v7116_v48 = vpop.eup %6047  ;;  %v3056_v26 = vmul.f32 1.442695, %v3028_v63  ;;  %v3029_v39 = vsub.f32 %v7037_v13, %v3009_v23  ;;  %6057 = vpow2.f32 %v3038_v29 }
 0x469   : > { %v2982_v2 = vpop.xlane.xlu1 %2981  ;;  %v3064_v57 = vsel %vm2615_vm1, %v7116_v48, 0.0 }
 0x46a   : > { %v7121_v12 = vpop.eup %6049  ;;  %6059 = vpow2.f32 %v3056_v26  ;;  %v3058_v42 = vmul.f32 1.442695, %v3029_v39  ;;  %v3020_v33 = vsub.f32 %v7043_v32, %v2982_v2  ;;  %3065 = vadd.xlane.f32.xlu1 %v3064_v57 }
 0x46b   : > { %v2985_v11 = vpop.xlane.xlu0 %2984  ;;  %v3088_v13 = vsel %vm2615_vm1, %v7121_v12, 0.0 }
 0x46c   : > { %v3040_v54 = vmul.f32 1.442695, %v3020_v33  ;;  %v3021_v51 = vsub.f32 %v7049_v9, %v2985_v11  ;;  %6061 = vpow2.f32 %v3058_v42 }
 0x46e   : > { %v7127_v46 = vpop.eup %6051  ;;  %6063 = vpow2.f32 %v3040_v54  ;;  %v3042_v45 = vmul.f32 1.442695, %v3021_v51  ;;  %3089 = vadd.xlane.f32.xlu1 %v3088_v13 }
 0x46f   : > { %v7129_v37 = vpop.eup %6053  ;;  %v3067_v0 = vsel %vm2615_vm1, %v7127_v46, 0.0 }
 0x470   : > { %v2988_v32 = vpop.xlane.xlu1 %2987  ;;  %v7133_v44 = vpop.eup %6055  ;;  %3068 = vadd.xlane.f32.xlu0 %v3067_v0  ;;  %6065 = vpow2.f32 %v3042_v45  ;;  %v3091_v24 = vsel %vm2615_vm1, %v7129_v37, 0.0 }
 0x471   : > { %v3022_v9 = vsub.f32 %v7053_v35, %v2988_v32  ;;  %v3070_v60 = vsel %vm2615_vm1, %v7133_v44, 0.0 }
 0x472   : > { %v2991_v50 = vpop.xlane.xlu0 %2990  ;;  %3071 = vadd.xlane.f32.xlu1 %v3070_v60  ;;  %v7139_v5 = vpop.eup %6057 }
 0x473   : > { %v3044_v20 = vmul.f32 1.442695, %v3022_v9  ;;  %v3023_v49 = vsub.f32 %v7057_v8, %v2991_v50  ;;  %v3073_v8 = vsel %vm2615_vm1, %v7139_v5, 0.0 }
 0x474   : > { %v7143_v56 = vpop.eup %6059  ;;  %3092 = vadd.xlane.f32.xlu0 %v3091_v24 }
 0x475   : > { %6067 = vpow2.f32 %v3044_v20  ;;  %v3046_v28 = vmul.f32 1.442695, %v3023_v49  ;;  %v3100_v35 = vsel %vm2615_vm1, %v7143_v56, 0.0 }
 0x476   : > { %3101 = vadd.xlane.f32.xlu1 %v3100_v35  ;;  %v7147_v36 = vpop.eup %6061 }
 0x477   : > { %6069 = vpow2.f32 %v3046_v28  ;;  %v3103_v18 = vsel %vm2615_vm1, %v7147_v36, 0.0 }
 0x478   : > { %v3000_v53 = vpop.xlane.xlu0 %2999  ;;  %v7151_v38 = vpop.eup %6063  ;;  %3074 = vadd.xlane.f32.xlu0 %v3073_v8 }
 0x479   : > { %v3026_v41 = vsub.f32 %v7061_v52, %v3000_v53  ;;  %v3076_v62 = vsel %vm2615_vm1, %v7151_v38, 0.0 }
 0x47a   : > { %3077 = vadd.xlane.f32.xlu1 %v3076_v62  ;;  %v7158_v47 = vpop.eup %6065 }
 0x47b   : > { %v3052_v30 = vmul.f32 1.442695, %v3026_v41  ;;  %v3079_v52 = vsel %vm2615_vm1, %v7158_v47, 0.0 }
 0x47c   : > { %v3003_v4 = vpop.xlane.xlu0 %3002  ;;  %3104 = vadd.xlane.f32.xlu0 %v3103_v18 }
 0x47d   : > { %6071 = vpow2.f32 %v3052_v30  ;;  %v3027_v29 = vsub.f32 %v7065_v34, %v3003_v4 }
 0x47f   : > { %v7161_v63 = vpop.eup %6067  ;;  %v3054_v23 = vmul.f32 1.442695, %v3027_v29 }
 0x480   : > { %v3012_v26 = vpop.xlane.xlu1 %3011  ;;  %v3082_v39 = vsel %vm2615_vm1, %v7161_v63, 0.0  ;;  %3080 = vadd.xlane.f32.xlu0 %v3079_v52 }
 0x481   : > { %v7167_v2 = vpop.eup %6069  ;;  %6073 = vpow2.f32 %v3054_v23  ;;  %v3030_v57 = vsub.f32 %v7069_v17, %v3012_v26  ;;  %3083 = vadd.xlane.f32.xlu1 %v3082_v39 }
 0x482   : > { %v3015_v42 = vpop.xlane.xlu0 %3014  ;;  %v3085_v34 = vsel %vm2615_vm1, %v7167_v2, 0.0 }
 0x483   : > { %v3060_v33 = vmul.f32 1.442695, %v3030_v57  ;;  %v3031_v11 = vsub.f32 %v7073_v43, %v3015_v42 }
 0x484   : > { %3086 = vadd.xlane.f32.xlu0 %v3085_v34 }
 0x485   : > { %6075 = vpow2.f32 %v3060_v33  ;;  %v3062_v54 = vmul.f32 1.442695, %v3031_v11 }
 0x486   : > { %v3960_v50 = vpop.trf.xlu1 }
 0x487   : > { %v7173_v51 = vpop.eup %6071  ;;  %6077 = vpow2.f32 %v3062_v54 }
 0x488   : > { %v3094_v13 = vsel %vm2615_vm1, %v7173_v51, 0.0  ;;  %v3976_v20 = vpop.trf.xlu0 }
 0x489   : > { %3095 = vadd.xlane.f32.xlu1 %v3094_v13  ;;  %v4100_v11 = vcombine.low %v7103_v27, %v3976_v20 }
 0x48b   : > { %v7177_v45 = vpop.eup %6073  ;;  %v4107_v27 = vrot.slane %v4100_v11, %v6438_v59 }
 0x48c   : > { %v3097_v17 = vsel %vm2615_vm1, %v7177_v45, 0.0 }
 0x48d   : > { %3098 = vadd.xlane.f32.xlu0 %v3097_v17 }
 0x48f   : > { %v7181_v0 = vpop.eup %6075 }
 0x490   : > { %v3106_v43 = vsel %vm2615_vm1, %v7181_v0, 0.0 }
 0x491   : > { %v7185_v32 = vpop.eup %6077  ;;  %3107 = vadd.xlane.f32.xlu1 %v3106_v43 }
 0x492   : > { %v3109_v9 = vsel %vm2615_vm1, %v7185_v32, 0.0 }
 0x493   : > { %3110 = vadd.xlane.f32.xlu0 %v3109_v9 }
 0x4be   : > { %3984 = vxpose.xlu1.c.b16.start.end [1/1] (short) (narrow) %v3754_v6, 16 }
 0x4c0   : > { %4000 = vxpose.xlu0.c.b16.start.end [1/1] (short) (narrow) %v7011_v61, 16 }
 0x4f7   : > { %v3066_v60 = vpop.xlane.xlu1 %3065 }
 0x4f8   : > { %6079 = vrcp.f32 %v3066_v60 }
 0x4fb   : > { %v3090_v49 = vpop.xlane.xlu1 %3089 }
 0x4fd   : > { %v3069_v24 = vpop.xlane.xlu0 %3068 }
 0x4fe   : > { %6081 = vrcp.f32 %v3069_v24 }
 0x4ff   : > { %v3072_v28 = vpop.xlane.xlu1 %3071 }
 0x500   : > { %6083 = vrcp.f32 %v3072_v28 }
 0x501   : > { %v3093_v35 = vpop.xlane.xlu0 %3092 }
 0x502   : > { %v6080_v8 = vpop.eup %6079 }
 0x503   : > { %v3128_v62 = vmul.f32 %v6080_v8, %v7116_v48  ;;  %v3102_v6 = vpop.xlane.xlu1 %3101 }
 0x505   : > { %v3075_v53 = vpop.xlane.xlu0 %3074 }
 0x506   : > { %6085 = vrcp.f32 %v3075_v53 }
 0x507   : > { %v3078_v52 = vpop.xlane.xlu1 %3077 }
 0x508   : > { %v6082_v41 = vpop.eup %6081 }
 0x509   : > { %v3129_v15 = vmul.f32 %v6082_v41, %v7127_v46  ;;  %v3105_v61 = vpop.xlane.xlu0 %3104 }
 0x50a   : > { %v6084_v4 = vpop.eup %6083 }
 0x50b   : > { %v3144_v58 = vpack.c.bf16 %v3129_v15, %v3128_v62  ;;  %v3130_v29 = vmul.f32 %v6084_v4, %v7133_v44 }
 0x50d   : > { %v4180_v30 = vsel %vm2615_vm1, %v3144_v58, 0  ;;  %v3081_v26 = vpop.xlane.xlu0 %3080  ;;  %v4124_v58 = vrot.slane %v4116_v55, %v6453_v16 }
 0x50e   : > { %5839 = vmatpush3.bf16.xpose.msra.mxu0 %v4180_v30  ;;  %v3084_v46 = vpop.xlane.xlu1 %3083  ;;  %6087 = vrcp.f32 %v3081_v26  ;;  %v4131_v30 = vrot.slane %v4117_v14, %v6453_v16 }
 0x50f   : > { %5850 = vmatprep.subr.bf16.mxu0 %v6211_v21 }
 0x510   : > { %v6086_v18 = vpop.eup %6085 }
 0x511   : > { %v3131_v23 = vmul.f32 %v6086_v18, %v7139_v5  ;;  %v3087_v57 = vpop.xlane.xlu0 %3086  ;;  %v4032_v5 = vcombine.low %v7101_v22, %v3960_v50  ;;  %v4056_v22 = vrot.slane %v4048_v1, %v6453_v16 }
 0x512   : > { %6089 = vrcp.f32 %v3087_v57 }
 0x513   : > { %v3145_v39 = vpack.c.bf16 %v3131_v23, %v3130_v29  ;;  %6091 = vrcp.f32 %v3078_v52  ;;  %v4039_v60 = vrot.slane %v4032_v5, %v6438_v59 }
 0x514   : > { %6093 = vrcp.f32 %v3084_v46 }
 0x515   : > { %v4227_v48 = vsel %vm2615_vm1, %v3145_v39, 0  ;;  %6095 = vrcp.f32 %v3090_v49 }
 0x516   : > { %5845 = vmatpush3.bf16.xpose.msra.mxu1 %v4227_v48  ;;  %v3096_v42 = vpop.xlane.xlu1 %3095  ;;  %6097 = vrcp.f32 %v3093_v35 }
 0x517   : > { %5856 = vmatprep.subr.bf16.mxu1 %v6211_v21  ;;  %6099 = vrcp.f32 %v3102_v6 }
 0x518   : > { %v6088_v17 = vpop.eup %6087 }
 0x519   : > { %v3133_v35 = vmul.f32 %v6088_v17, %v7158_v47 }
 0x51a   : > { %v3099_v34 = vpop.xlane.xlu0 %3098 }
 0x51b   : > { %6101 = vrcp.f32 %v3099_v34 }
 0x51c   : > { %v6090_v9 = vpop.eup %6089  ;;  %6103 = vrcp.f32 %v3096_v42 }
 0x51d   : > { %v6092_v53 = vpop.eup %6091  ;;  %v3135_v8 = vmul.f32 %v6090_v9, %v7167_v2  ;;  %6105 = vrcp.f32 %v3105_v61 }
 0x51e   : > { %v3108_v33 = vpop.xlane.xlu1 %3107  ;;  %v3132_v19 = vmul.f32 %v6092_v53, %v7151_v38 }
 0x51f   : > { %6107 = vrcp.f32 %v3108_v33 }
 0x520   : > { %v3111_v44 = vpop.xlane.xlu0 %3110  ;;  %v3146_v38 = vpack.c.bf16 %v3133_v35, %v3132_v19 }
 0x521   : > { %6109 = vrcp.f32 %v3111_v44 }
 0x522   : > { %v4274_v17 = vsel %vm2615_vm1, %v3146_v38, 0 }
 0x524   : > { %v3992_v54 = vpop.trf.xlu1 }
 0x525   : > { %v4040_v13 = vcombine.low %v7105_v25, %v3992_v54  ;;  %v6094_v25 = vpop.eup %6093 }
 0x526   : > { %v4008_v43 = vpop.trf.xlu0  ;;  %v3134_v40 = vmul.f32 %v6094_v25, %v7161_v63  ;;  %v6096_v63 = vpop.eup %6095 }
 0x527   : > { %v4047_v24 = vrot.slane %v4040_v13, %v6438_v59  ;;  %v4108_v28 = vcombine.low %v7107_v3, %v4008_v43  ;;  %v4063_v3 = vrot.slane %v4049_v7, %v6453_v16  ;;  %v6098_v26 = vpop.eup %6097 }
 0x528   : > { %v3147_v61 = vpack.c.bf16 %v3135_v8, %v3134_v40  ;;  %v6100_v14 = vpop.eup %6099  ;;  %v3137_v9 = vmul.f32 %v6098_v26, %v7129_v37 }
 0x529   : > { %v4064_v50 = vcombine.low %v4039_v60, %v4047_v24  ;;  %v4065_v20 = vcombine.high %v4039_v60, %v4047_v24  ;;  %v4115_v49 = vrot.slane %v4108_v28, %v6438_v59  ;;  %v6102_v33 = vpop.eup %6101 }
 0x52a   : > { %v6104_v13 = vpop.eup %6103  ;;  %v3139_v25 = vmul.f32 %v6102_v33, %v7177_v45 }
 0x52b   : > { %v4072_v1 = vrot.slane %v4064_v50, %v6453_v16  ;;  %v4079_v41 = vrot.slane %v4065_v20, %v6453_v16  ;;  %v4132_v62 = vcombine.low %v4107_v27, %v4115_v49  ;;  %v4133_v15 = vcombine.high %v4107_v27, %v4115_v49  ;;  %v6106_v53 = vpop.eup %6105 }
 0x52c   : > { %v3136_v27 = vmul.f32 %v6096_v63, %v7121_v12  ;;  %v6108_v37 = vpop.eup %6107  ;;  %v3138_v20 = vmul.f32 %v6104_v13, %v7173_v51  ;;  %v3141_v12 = vmul.f32 %v6106_v53, %v7147_v36  ;;  %v3140_v51 = vmul.f32 %v6100_v14, %v7143_v56 }
 0x52d   : > { %v4080_v7 = vcombine.low %v4056_v22, %v4072_v1  ;;  %v4081_v47 = vcombine.high %v4056_v22, %v4072_v1  ;;  %v7227_v6 = vcombine.low %v4063_v3, %v4079_v41  ;;  %v7229_v2 = vcombine.high %v4063_v3, %v4079_v41  ;;  %v6110_v49 = vpop.eup %6109 }
 0x52e   : > { %v4140_v4 = vrot.slane %v4132_v62, %v6453_v16  ;;  %v4147_v55 = vrot.slane %v4133_v15, %v6453_v16  ;;  %v4321_v22 = vsel %vm2615_vm1, %v3147_v61, 0  ;;  %v3148_v50 = vpack.c.bf16 %v3137_v9, %v3136_v27 }
 0x52f   : > { %v4155_v39 = vshrl.u32 %v4080_v7, 16  ;;  %v4161_v48 = vshrl.u32 %v4081_v47, 16  ;;  %v4167_v31 = vshrl.u32 %v7227_v6, 16  ;;  %v4173_v10 = vshrl.u32 %v7229_v2, 16 }
 0x530   : > { %v4148_v18 = vcombine.low %v4124_v58, %v4140_v4  ;;  %v4149_v29 = vcombine.high %v4124_v58, %v4140_v4  ;;  %v4150_v23 = vcombine.low %v4131_v30, %v4147_v55  ;;  %v7237_v52 = vcombine.high %v4131_v30, %v4147_v55 }
 0x531   : > { %v3149_v3 = vpack.c.bf16 %v3139_v25, %v3138_v20  ;;  %v4368_v35 = vsel %vm2615_vm1, %v3148_v50, 0  ;;  %v3143_v8 = vmul.f32 %v6110_v49, %v7185_v32  ;;  %v3150_v1 = vpack.c.bf16 %v3141_v12, %v3140_v51 }
 0x532   : > { %v4154_v46 = vpack.i.b16 %v4148_v18, %v4080_v7  ;;  %v4156_v57 = vshrl.u32 %v4148_v18, 16  ;;  %v4160_v42 = vpack.i.b16 %v4149_v29, %v4081_v47  ;;  %v4162_v34 = vshrl.u32 %v4149_v29, 16 }
 0x533   : > { %v4166_v44 = vpack.i.b16 %v4150_v23, %v7227_v6  ;;  %v4168_v5 = vshrl.u32 %v4150_v23, 16  ;;  %v4172_v11 = vpack.i.b16 %v7237_v52, %v7229_v2  ;;  %v4174_v54 = vshrl.u32 %v7237_v52, 16 }
 0x534   : > { %5841 = vmatmul.mubr.msk.bf16.vlgmr.msra.gmra.mrb[12].mxu0 %vm2615_vm1, %v4154_v46  ;;  %v4157_v43 = vpack.i.b16 %v4156_v57, %v4155_v39  ;;  %v4163_v60 = vpack.i.b16 %v4162_v34, %v4161_v48  ;;  %v4415_v45 = vsel %vm2615_vm1, %v3149_v3, 0  ;;  %v3142_v36 = vmul.f32 %v6108_v37, %v7181_v0 }
 0x535   : > { %5851 = vmatpush3.bf16.xpose.msra.mxu0 %v4274_v17  ;;  %5852 = vmatprep.mubr.msk.bf16.mxu0 %vm6212_vm0, %v6211_v21  ;;  %v4169_v24 = vpack.i.b16 %v4168_v5, %v4167_v31  ;;  %v4175_v28 = vpack.i.b16 %v4174_v54, %v4173_v10  ;;  %v4462_v62 = vsel %vm2615_vm1, %v3150_v1, 0  ;;  %v6039_v5 = vld [vmem:[%s7472_s2] sm:$0xff]  }
 0x536   : > { %5847 = vmatmul.mubr.msk.bf16.vlgmr.msra.gmra.mrb[28].mxu1 %vm2615_vm1, %v4157_v43  ;;  %5862 = vmatprep.subr.bf16.mxu0 %v6211_v21  ;;  %v3151_v41 = vpack.c.bf16 %v3143_v8, %v3142_v36 }
 0x537   : > { %5857 = vmatpush3.bf16.xpose.msra.mxu1 %v4321_v22  ;;  %5858 = vmatprep.mubr.msk.bf16.mxu1 %vm6212_vm0, %v6211_v21 }
 0x538   : > { %5868 = vmatprep.subr.bf16.mxu1 %v6211_v21  ;;  %v4509_v56 = vsel %vm2615_vm1, %v3151_v41, 0 }
 0x53c   : > { %5853 = vmatmul.mubr.msk.bf16.vlgmr.msra.gmra.mrb[16].mxu0 %vm2615_vm1, %v4160_v42 }
 0x53d   : > { %5863 = vmatpush3.bf16.xpose.msra.mxu0 %v4368_v35  ;;  %5864 = vmatprep.mubr.msk.bf16.mxu0 %vm6212_vm0, %v6211_v21 }
 0x53e   : > { %5859 = vmatmul.mubr.msk.bf16.vlgmr.msra.gmra.mrb[32].mxu1 %vm2615_vm1, %v4163_v60  ;;  %5874 = vmatprep.subr.bf16.mxu0 %v6211_v21 }
 0x53f   : > { %5869 = vmatpush3.bf16.xpose.msra.mxu1 %v4415_v45  ;;  %5870 = vmatprep.mubr.msk.bf16.mxu1 %vm6212_vm0, %v6211_v21 }
 0x540   : > { %5880 = vmatprep.subr.bf16.mxu1 %v6211_v21 }
 0x544   : > { %5865 = vmatmul.mubr.msk.bf16.vlgmr.msra.gmra.mrb[20].mxu0 %vm2615_vm1, %v4166_v44 }
 0x545   : > { %5875 = vmatpush3.bf16.xpose.msra.mxu0 %v4462_v62  ;;  %5876 = vmatprep.mubr.msk.bf16.mxu0 %vm6212_vm0, %v6211_v21 }
 0x546   : > { %5871 = vmatmul.mubr.msk.bf16.vlgmr.msra.gmra.mrb[36].mxu1 %vm2615_vm1, %v4169_v24  ;;  %5886 = vmatprep.subr.bf16.mxu0 %v6211_v21 }
 0x547   : > { %5881 = vmatpush3.bf16.xpose.msra.mxu1 %v4509_v56  ;;  %5882 = vmatprep.mubr.msk.bf16.mxu1 %vm6212_vm0, %v6211_v21 }
 0x54c   : > { %5877 = vmatmul.mubr.msk.bf16.vlgmr.msra.gmra.mrb[24].mxu0 %vm2615_vm1, %v4172_v11  ;;  %v6040_v11 = vld [vmem:[%s7472_s2 + $0x8] sm:$0xff]  }
 0x54d   : > { %5902 = vmatprep.mubr.msk.bf16.mxu0 %vm6212_vm0, %v6211_v21  ;;  %5887 = vmatpush3.bf16.msra.mxu0 %v6039_v5 }
 0x54e   : > { %5883 = vmatmul.mubr.msk.bf16.vlgmr.msra.gmra.mrb[40].mxu1 %vm2615_vm1, %v4175_v28  ;;  %5888 = vmatprep.subr.bf16.mxu0 %v6211_v21 }
 0x551   : > { %5889 = vmatpush3.bf16.msra.mxu0 %v6040_v11 }
 0x552   : > { %5890 = vmatprep.subr.bf16.mxu0 %v6211_v21 }
 0x607   : > { %v4216_v0 = vpop.f32.mrb[12].mxu0 }
 0x608   : > { %4552 = vxpose.xlu1.b32.start [1/2] (short) (narrow) %v4216_v0, 16  ;;  %v5842_v32 = vpop.f32.mrb[13].mxu0 }
 0x609   : > { %v4219_v15 = vpop.f32.mrb[14].mxu0  ;;  %v4263_v58 = vpop.f32.mrb[28].mxu1 }
 0x60a   : > { %4584 = vxpose.xlu0.b32.start [1/2] (short) (narrow) %v4263_v58, 16  ;;  %v5843_v19 = vpop.f32.mrb[15].mxu0  ;;  %v5848_v40 = vpop.f32.mrb[29].mxu1 }
 0x60b   : > { %v4266_v7 = vpop.f32.mrb[30].mxu1 }
 0x60c   : > { %v5849_v47 = vpop.f32.mrb[31].mxu1  ;;  %4553 = vxpose.xlu1.b32.end [2/2] (short) (narrow) %v4219_v15, 16 }
 0x60e   : > { %4585 = vxpose.xlu0.b32.end [2/2] (short) (narrow) %v4266_v7, 16 }
 0x60f   : > { %v4310_v6 = vpop.f32.mrb[16].mxu0 }
 0x610   : > { %v5854_v2 = vpop.f32.mrb[17].mxu0 }
 0x611   : > { %v4313_v30 = vpop.f32.mrb[18].mxu0  ;;  %v4357_v4 = vpop.f32.mrb[32].mxu1 }
 0x612   : > { %v5860_v55 = vpop.f32.mrb[33].mxu1  ;;  %4648 = vxpose.xlu1.b32.start [1/2] (short) (narrow) %v4357_v4, 16  ;;  %4616 = vxpose.xlu0.b32.start [1/2] (short) (narrow) %v4310_v6, 16  ;;  %v5855_v38 = vpop.f32.mrb[19].mxu0 }
 0x613   : > { %v4360_v61 = vpop.f32.mrb[34].mxu1 }
 0x614   : > { %v5861_v63 = vpop.f32.mrb[35].mxu1 }
 0x616   : > { %4649 = vxpose.xlu1.b32.end [2/2] (short) (narrow) %v4360_v61, 16  ;;  %4617 = vxpose.xlu0.b32.end [2/2] (short) (narrow) %v4313_v30, 16 }
 0x617   : > { %v4404_v18 = vpop.f32.mrb[20].mxu0 }
 0x618   : > { %v5866_v29 = vpop.f32.mrb[21].mxu0 }
 0x619   : > { %v4407_v23 = vpop.f32.mrb[22].mxu0  ;;  %v4451_v52 = vpop.f32.mrb[36].mxu1 }
 0x61a   : > { %v5872_v26 = vpop.f32.mrb[37].mxu1  ;;  %4712 = vxpose.xlu1.b32.start [1/2] (short) (narrow) %v4451_v52, 16  ;;  %4680 = vxpose.xlu0.b32.start [1/2] (short) (narrow) %v4404_v18, 16  ;;  %v5867_v39 = vpop.f32.mrb[23].mxu0 }
 0x61b   : > { %v4454_v48 = vpop.f32.mrb[38].mxu1 }
 0x61c   : > { %v5873_v31 = vpop.f32.mrb[39].mxu1 }
 0x61e   : > { %4713 = vxpose.xlu1.b32.end [2/2] (short) (narrow) %v4454_v48, 16  ;;  %4681 = vxpose.xlu0.b32.end [2/2] (short) (narrow) %v4407_v23, 16 }
 0x61f   : > { %v4498_v10 = vpop.f32.mrb[24].mxu0 }
 0x620   : > { %v5878_v14 = vpop.f32.mrb[25].mxu0 }
 0x621   : > { %v4501_v46 = vpop.f32.mrb[26].mxu0  ;;  %v4545_v57 = vpop.f32.mrb[40].mxu1 }
 0x622   : > { %v5884_v42 = vpop.f32.mrb[41].mxu1  ;;  %4776 = vxpose.xlu1.b32.start [1/2] (short) (narrow) %v4545_v57, 16  ;;  %4744 = vxpose.xlu0.b32.start [1/2] (short) (narrow) %v4498_v10, 16  ;;  %v5879_v34 = vpop.f32.mrb[27].mxu0 }
 0x623   : > { %v4548_v33 = vpop.f32.mrb[42].mxu1 }
 0x624   : > { %v5885_v44 = vpop.f32.mrb[43].mxu1 }
 0x626   : > { %4777 = vxpose.xlu1.b32.end [2/2] (short) (narrow) %v4548_v33, 16  ;;  %4745 = vxpose.xlu0.b32.end [2/2] (short) (narrow) %v4501_v46, 16 }
 0x688   : > { %v4568_v54 = vpop.trf.xlu1 }
 0x68a   : > { %v4600_v13 = vpop.trf.xlu0 }
 0x68c   : > { %v4569_v17 = vpop.trf.xlu1 }
 0x68e   : > { %v4601_v43 = vpop.trf.xlu0 }
 0x692   : > { %v4664_v9 = vpop.trf.xlu1  ;;  %v4632_v60 = vpop.trf.xlu0 }
 0x693   : > { %v4824_v24 = vcombine.low %v4600_v13, %v4664_v9  ;;  %v4825_v28 = vcombine.high %v4600_v13, %v4664_v9  ;;  %v4808_v53 = vcombine.low %v4568_v54, %v4632_v60  ;;  %v4809_v22 = vcombine.high %v4568_v54, %v4632_v60 }
 0x695   : > { %v4832_v27 = vrot.slane %v4824_v24, %v6438_v59  ;;  %v4839_v25 = vrot.slane %v4825_v28, %v6438_v59  ;;  %v4816_v37 = vrot.slane %v4808_v53, %v6438_v59  ;;  %v4823_v50 = vrot.slane %v4809_v22, %v6438_v59 }
 0x696   : > { %v4665_v20 = vpop.trf.xlu1  ;;  %v4633_v49 = vpop.trf.xlu0 }
 0x697   : > { %v4872_v3 = vcombine.low %v4816_v37, %v4832_v27  ;;  %v4873_v35 = vcombine.high %v4816_v37, %v4832_v27  ;;  %v4888_v12 = vcombine.low %v4823_v50, %v4839_v25  ;;  %v4889_v45 = vcombine.high %v4823_v50, %v4839_v25 }
 0x698   : > { %v4960_v51 = vcombine.low %v4601_v43, %v4665_v20  ;;  %v4961_v8 = vcombine.high %v4601_v43, %v4665_v20  ;;  %v4944_v1 = vcombine.low %v4569_v17, %v4633_v49  ;;  %v4945_v36 = vcombine.high %v4569_v17, %v4633_v49 }
 0x699   : > { %v4880_v41 = vrot.slane %v4872_v3, %v6453_v16  ;;  %v4887_v62 = vrot.slane %v4873_v35, %v6453_v16  ;;  %v4896_v56 = vrot.slane %v4888_v12, %v6453_v16  ;;  %v4903_v0 = vrot.slane %v4889_v45, %v6453_v16 }
 0x69a   : > { %v4968_v32 = vrot.slane %v4960_v51, %v6438_v59  ;;  %v4975_v15 = vrot.slane %v4961_v8, %v6438_v59  ;;  %v4952_v58 = vrot.slane %v4944_v1, %v6438_v59  ;;  %v4959_v19 = vrot.slane %v4945_v36, %v6438_v59  ;;  %v4728_v40 = vpop.trf.xlu1  ;;  %v4696_v7 = vpop.trf.xlu0 }
 0x69b   : > { %v5688_v47 = vcombine.low %v4880_v41, %v4887_v62  ;;  %v5690_v6 = vcombine.high %v4880_v41, %v4887_v62  ;;  %v5692_v2 = vcombine.low %v4896_v56, %v4903_v0  ;;  %v5694_v30 = vcombine.high %v4896_v56, %v4903_v0 }
 0x69c   : > { %v5008_v4 = vcombine.low %v4952_v58, %v4968_v32  ;;  %v5009_v55 = vcombine.high %v4952_v58, %v4968_v32  ;;  %v5024_v38 = vcombine.low %v4959_v19, %v4975_v15  ;;  %v5025_v61 = vcombine.high %v4959_v19, %v4975_v15 }
 0x69d   : > { %v5088_v63 = vrot.slane %v5688_v47, %v6438_v59  ;;  %v5104_v18 = vrot.slane %v5690_v6, %v6438_v59  ;;  %v5120_v29 = vrot.slane %v5692_v2, %v6438_v59  ;;  %v5136_v23 = vrot.slane %v5694_v30, %v6438_v59 }
 0x69e   : > { %v5016_v52 = vrot.slane %v5008_v4, %v6453_v16  ;;  %v5023_v26 = vrot.slane %v5009_v55, %v6453_v16  ;;  %v5032_v39 = vrot.slane %v5024_v38, %v6453_v16  ;;  %v5039_v48 = vrot.slane %v5025_v61, %v6453_v16  ;;  %v4729_v31 = vpop.trf.xlu1  ;;  %v4697_v10 = vpop.trf.xlu0 }
 0x69f   : > { %v5145_v14 = vcombine.high %v5088_v63, %v5104_v18  ;;  %v5177_v46 = vcombine.high %v5120_v29, %v5136_v23  ;;  %v5144_v57 = vcombine.low %v5088_v63, %v5104_v18  ;;  %v5176_v42 = vcombine.low %v5120_v29, %v5136_v23  ;;  %v6041_v18 = vld [vmem:[%s7472_s2 + $0x10] sm:$0xff]  }
 0x6a0   : > { %v5696_v34 = vcombine.low %v5016_v52, %v5023_v26  ;;  %v5698_v33 = vcombine.high %v5016_v52, %v5023_v26  ;;  %v5700_v44 = vcombine.low %v5032_v39, %v5039_v48  ;;  %v5702_v5 = vcombine.high %v5032_v39, %v5039_v48  ;;  %5891 = vmatpush3.bf16.msra.mxu0 %v6041_v18 }
 0x6a1   : > { %v7315_v11 = vrot.slane %v5145_v14, %v6453_v16  ;;  %v7318_v54 = vrot.slane %v5177_v46, %v6453_v16  ;;  %v7321_v13 = vrot.slane %v5144_v57, %v6453_v16  ;;  %v7324_v17 = vrot.slane %v5176_v42, %v6453_v16  ;;  %v6042_v14 = vld [vmem:[%s7472_s2 + $0x18] sm:$0xff]   ;;  %5892 = vmatprep.subr.bf16.mxu0 %v6211_v21 }
 0x6a2   : > { %v5224_v43 = vrot.slane %v5696_v34, %v6438_v59  ;;  %v5240_v9 = vrot.slane %v5698_v33, %v6438_v59  ;;  %v5256_v60 = vrot.slane %v5700_v44, %v6438_v59  ;;  %v5272_v24 = vrot.slane %v5702_v5, %v6438_v59  ;;  %v4792_v28 = vpop.trf.xlu1  ;;  %v4760_v53 = vpop.trf.xlu0 }
 0x6a3   : > { %v4856_v22 = vcombine.low %v4728_v40, %v4792_v28  ;;  %v4857_v27 = vcombine.high %v4728_v40, %v4792_v28  ;;  %v4840_v25 = vcombine.low %v4696_v7, %v4760_v53  ;;  %v4841_v37 = vcombine.high %v4696_v7, %v4760_v53 }
 0x6a4   : > { %v5210_v50 = vcombine.low %v7315_v11, %v7318_v54  ;;  %v5281_v20 = vcombine.high %v5224_v43, %v5240_v9  ;;  %v5313_v49 = vcombine.high %v5256_v60, %v5272_v24  ;;  %v5209_v3 = vcombine.high %v7321_v13, %v7324_v17  ;;  %5893 = vmatpush3.bf16.msra.mxu0 %v6042_v14 }
 0x6a5   : > { %v4864_v35 = vrot.slane %v4856_v22, %v6438_v59  ;;  %v4871_v12 = vrot.slane %v4857_v27, %v6438_v59  ;;  %v4848_v45 = vrot.slane %v4840_v25, %v6438_v59  ;;  %v4855_v51 = vrot.slane %v4841_v37, %v6438_v59  ;;  %v6043_v37 = vld [vmem:[%s7472_s2 + $0x20] sm:$0xff]   ;;  %5894 = vmatprep.subr.bf16.mxu0 %v6211_v21 }
 0x6a6   : > { %v4793_v8 = vpop.trf.xlu1  ;;  %v4761_v1 = vpop.trf.xlu0  ;;  %v5295_v36 = vrot.slane %v5281_v20, %v6453_v16  ;;  %v5327_v41 = vrot.slane %v5313_v49, %v6453_v16  ;;  %v5280_v62 = vcombine.low %v5224_v43, %v5240_v9  ;;  %v5312_v56 = vcombine.low %v5256_v60, %v5272_v24 }
 0x6a7   : > { %v4904_v0 = vcombine.low %v4848_v45, %v4864_v35  ;;  %v4905_v32 = vcombine.high %v4848_v45, %v4864_v35  ;;  %v4920_v15 = vcombine.low %v4855_v51, %v4871_v12  ;;  %v4921_v58 = vcombine.high %v4855_v51, %v4871_v12 }
 0x6a8   : > { %v4992_v19 = vcombine.low %v4729_v31, %v4793_v8  ;;  %v4993_v40 = vcombine.high %v4729_v31, %v4793_v8  ;;  %v4976_v7 = vcombine.low %v4697_v10, %v4761_v1  ;;  %v4977_v47 = vcombine.high %v4697_v10, %v4761_v1  ;;  %5895 = vmatpush3.bf16.msra.mxu0 %v6043_v37 }
 0x6a9   : > { %v4912_v6 = vrot.slane %v4904_v0, %v6453_v16  ;;  %v4919_v2 = vrot.slane %v4905_v32, %v6453_v16  ;;  %v4928_v30 = vrot.slane %v4920_v15, %v6453_v16  ;;  %v4935_v4 = vrot.slane %v4921_v58, %v6453_v16  ;;  %v6044_v32 = vld [vmem:[%s7472_s2 + $0x28] sm:$0xff]   ;;  %5896 = vmatprep.subr.bf16.mxu0 %v6211_v21 }
 0x6aa   : > { %v5000_v55 = vrot.slane %v4992_v19, %v6438_v59  ;;  %v5007_v38 = vrot.slane %v4993_v40, %v6438_v59  ;;  %v4984_v61 = vrot.slane %v4976_v7, %v6438_v59  ;;  %v4991_v63 = vrot.slane %v4977_v47, %v6438_v59 }
 0x6ab   : > { %v5689_v29 = vcombine.low %v4912_v6, %v4919_v2  ;;  %v5691_v23 = vcombine.high %v4912_v6, %v4919_v2  ;;  %v5693_v52 = vcombine.low %v4928_v30, %v4935_v4  ;;  %v5695_v26 = vcombine.high %v4928_v30, %v4935_v4 }
 0x6ac   : > { %v5040_v39 = vcombine.low %v4984_v61, %v5000_v55  ;;  %v5041_v48 = vcombine.high %v4984_v61, %v5000_v55  ;;  %v5056_v31 = vcombine.low %v4991_v63, %v5007_v38  ;;  %v5057_v10 = vcombine.high %v4991_v63, %v5007_v38  ;;  %5897 = vmatpush3.bf16.msra.mxu0 %v6044_v32  ;;  %v6045_v38 = vld [vmem:[%s7472_s2 + $0x30] sm:$0xff]  }
 0x6ad   : > { %v5095_v46 = vrot.slane %v5689_v29, %v6438_v59  ;;  %v5111_v57 = vrot.slane %v5691_v23, %v6438_v59  ;;  %v5127_v42 = vrot.slane %v5693_v52, %v6438_v59  ;;  %v5143_v34 = vrot.slane %v5695_v26, %v6438_v59  ;;  %5898 = vmatprep.subr.bf16.mxu0 %v6211_v21  ;;  %v6046_v52 = vld [vmem:[%s7472_s2 + $0x38] sm:$0xff]  }
 0x6ae   : > { %v5048_v33 = vrot.slane %v5040_v39, %v6453_v16  ;;  %v5055_v44 = vrot.slane %v5041_v48, %v6453_v16  ;;  %v5064_v5 = vrot.slane %v5056_v31, %v6453_v16  ;;  %v5071_v43 = vrot.slane %v5057_v10, %v6453_v16 }
 0x6af   : > { %v5346_v9 = vcombine.low %v5295_v36, %v5327_v41  ;;  %v7364_v60 = vrot.slane %v5280_v62, %v6453_v16  ;;  %v7367_v24 = vrot.slane %v5312_v56, %v6453_v16  ;;  %v5211_v28 = vcombine.high %v7315_v11, %v7318_v54 }
 0x6b0   : > { %v5697_v53 = vcombine.low %v5048_v33, %v5055_v44  ;;  %v5699_v22 = vcombine.high %v5048_v33, %v5055_v44  ;;  %v5701_v27 = vcombine.low %v5064_v5, %v5071_v43  ;;  %v5703_v25 = vcombine.high %v5064_v5, %v5071_v43  ;;  %5899 = vmatpush3.bf16.msra.mxu0 %v6045_v38 }
 0x6b1   : > { %v5977_v20 = vpack.i.bf16 %v5346_v9, %v5210_v50  ;;  %v5345_v49 = vcombine.high %v7364_v60, %v7367_v24  ;;  %v5347_v35 = vcombine.high %v5295_v36, %v5327_v41  ;;  %v5160_v12 = vcombine.low %v5095_v46, %v5111_v57  ;;  %5900 = vmatprep.subr.bf16.mxu0 %v6211_v21 }
 0x6b2   : > { %v5231_v45 = vrot.slane %v5697_v53, %v6438_v59  ;;  %v5247_v11 = vrot.slane %v5699_v22, %v6438_v59  ;;  %v5263_v54 = vrot.slane %v5701_v27, %v6438_v59  ;;  %v5279_v51 = vrot.slane %v5703_v25, %v6438_v59 }
 0x6b3   : > { %5978 = vrot.lane.b32.xlu1 %v5977_v20, %s6218_s10  ;;  %v5972_v50 = vpack.i.bf16 %v5345_v49, %v5209_v3  ;;  %v5982_v8 = vpack.i.bf16 %v5347_v35, %v5211_v28  ;;  %v5168_v1 = vrot.slane %v5160_v12, %v6453_v16  ;;  %v5192_v36 = vcombine.low %v5127_v42, %v5143_v34  ;;  %s6145_s10 = scalar_lea.vmem %s6144_s13, 512 }
 0x6b4   : > { %v5296_v41 = vcombine.low %v5231_v45, %v5247_v11  ;;  %v5328_v62 = vcombine.low %v5263_v54, %v5279_v51  ;;  %v5161_v56 = vcombine.high %v5095_v46, %v5111_v57  ;;  %v5193_v0 = vcombine.high %v5127_v42, %v5143_v34  ;;  %5901 = vmatpush3.bf16.msra.mxu0 %v6046_v52 }
 0x6b5   : > { %5973 = vrot.lane.b32.xlu0 %v5972_v50, %s6219_s11  ;;  %v5200_v59 = vrot.slane %v5192_v36, %v6453_v16  ;;  %v5297_v15 = vcombine.high %v5231_v45, %v5247_v11  ;;  %v5329_v58 = vcombine.high %v5263_v54, %v5279_v51  ;;  %v5208_v3 = vcombine.low %v7321_v13, %v7324_v17 }
 0x6b6   : > { %v5304_v19 = vrot.slane %v5296_v41, %v6453_v16  ;;  %v5336_v40 = vrot.slane %v5328_v62, %v6453_v16  ;;  %v5175_v7 = vrot.slane %v5161_v56, %v6453_v16  ;;  %v5207_v47 = vrot.slane %v5193_v0, %v6453_v16  ;;  %v5704_v56 = vld [vmem:[%s7473_s3] ss:$0 sm:$0xff] }
 0x6b7   : > { %5983 = vrot.lane.b32.xlu1 %v5982_v8, %s6217_s9  ;;  %v5311_v6 = vrot.slane %v5297_v15, %v6453_v16  ;;  %v5343_v2 = vrot.slane %v5329_v58, %v6453_v16  ;;  %v5213_v30 = vcombine.high %v5168_v1, %v5200_v59  ;;  %v5212_v55 = vcombine.low %v5168_v1, %v5200_v59 }
 0x6b8   : > { %v5349_v4 = vcombine.high %v5304_v19, %v5336_v40  ;;  %v5348_v13 = vcombine.low %v5304_v19, %v5336_v40  ;;  %v5344_v17 = vcombine.low %v7364_v60, %v7367_v24  ;;  %v5215_v16 = vcombine.high %v5175_v7, %v5207_v47 }
 0x6b9   : > { %v5351_v18 = vcombine.high %v5311_v6, %v5343_v2  ;;  %v5350_v29 = vcombine.low %v5311_v6, %v5343_v2  ;;  %v5214_v23 = vcombine.low %v5175_v7, %v5207_v47 }
 0x6ba   : > { %v5992_v61 = vpack.i.bf16 %v5349_v4, %v5213_v30  ;;  %v5987_v63 = vpack.i.bf16 %v5348_v13, %v5212_v55 }
 0x6bb   : > { %v6002_v26 = vpack.i.bf16 %v5351_v18, %v5215_v16  ;;  %v5997_v39 = vpack.i.bf16 %v5350_v29, %v5214_v23 }
 0x6bc   : > { %5993 = vrot.lane.b32.xlu0 %v5992_v61, %s6213_s5  ;;  %5988 = vrot.lane.b32.xlu1 %v5987_v63, %s6215_s7  ;;  %s203_s5 = sand.u32 1, %s6197_s16  }
 0x6bd   : > { %s7429_s30 = scalar_lea.sflag [#allocation4], %s203_s5 }
 0x6c0   : > { %6003 = vrot.lane.b32.xlu0 %v6002_v26, %s6214_s6  ;;  %5998 = vrot.lane.b32.xlu1 %v5997_v39, %s6216_s8  ;;  %s5637_s6 = sshll.u32 %s203_s5, 4 }
 0x6c1   : > { %s205_s20 = scalar_lea.vmem [#allocation5], %s5637_s6 }
 0x6c2   : > { %s5557_s22 = sshll.u32 %s205_s20, 4  ;;  %s7422_s22 = int_to_ptr.vmem [resolvable:$true] %s5557_s22 }
 0x6c3   : > { %s6139_s19 = scalar_lea.vmem %s7422_s22, 256  ;;  %p6146_p2 = scmp.lt.s32.totalorder %s7422_s22, %s6144_s13 }
 0x6c4   : > { %p6140_p6 = scmp.ne.s32.totalorder %s7422_s22, %s6139_s19  ;;  %p6147_p3 = scmp.lt.s32.totalorder %s6145_s10, %s6139_s19 }
 0x6c6   : > { %p6141_p10 = pnand %p6140_p6, %p7485_p9  ;;  %p6148_p4 = por %p6147_p3, %p6146_p2 }
 0x6c8   : > { %p6142_p12 = pneg %p6141_p10 }
 0x6ca   : > { %p6149_p7 = pnand %p6148_p4, %p6142_p12 }
 0x725   : > { %v5979_v48 = vpop.permute.xlu1 %5978 }
 0x726   : > { %v5981_v57 = vunpack.i.h.bf16 %v5979_v48  ;;  %v5980_v42 = vunpack.i.l.bf16 %v5979_v48 }
 0x727   : > { %v5974_v31 = vpop.permute.xlu0 %5973 }
 0x728   : > { %v5976_v10 = vunpack.i.h.bf16 %v5974_v31  ;;  %v5975_v14 = vunpack.i.l.bf16 %v5974_v31 }
 0x729   : > { %v5984_v46 = vpop.permute.xlu1 %5983 }
 0x72a   : > { %v5409_v34 = vsel %vm2615_vm1, %v5344_v17, %v5976_v10  ;;  %v5408_v33 = vsel %vm2615_vm1, %v5208_v3, %v5975_v14  ;;  %v5986_v44 = vunpack.i.h.bf16 %v5984_v46  ;;  %v5985_v5 = vunpack.i.l.bf16 %v5984_v46 }
 0x72b   : > { %v5411_v9 = vsel %vm5410_vm2, %v5408_v33, %v5980_v42  ;;  %v5412_v60 = vsel %vm5410_vm2, %v5409_v34, %v5981_v57 }
 0x72c   : > { %v5414_v53 = vsel %vm5413_vm3, %v5411_v9, %v5985_v5  ;;  %v5415_v22 = vsel %vm5413_vm3, %v5412_v60, %v5986_v44 }
 0x72e   : > { %v5989_v21 = vpop.permute.xlu1 %5988  ;;  %v5994_v43 = vpop.permute.xlu0 %5993 }
 0x72f   : > { %v5991_v24 = vunpack.i.h.bf16 %v5989_v21  ;;  %v5990_v28 = vunpack.i.l.bf16 %v5989_v21  ;;  %v5996_v27 = vunpack.i.h.bf16 %v5994_v43  ;;  %v5995_v25 = vunpack.i.l.bf16 %v5994_v43 }
 0x731   : > { %v5417_v37 = vsel %vm5416_vm4, %v5414_v53, %v5990_v28  ;;  %v5418_v20 = vsel %vm5416_vm4, %v5415_v22, %v5991_v24 }
 0x732   : > { %v5999_v49 = vpop.permute.xlu1 %5998  ;;  %v6004_v35 = vpop.permute.xlu0 %6003  ;;  %v5420_v51 = vsel %vm5419_vm5, %v5417_v37, %v5995_v25  ;;  %v5421_v50 = vsel %vm5419_vm5, %v5418_v20, %v5996_v27 }
 0x733   : > { %v6001_v12 = vunpack.i.h.bf16 %v5999_v49  ;;  %v6000_v45 = vunpack.i.l.bf16 %v5999_v49  ;;  %v6006_v11 = vunpack.i.h.bf16 %v6004_v35  ;;  %v6005_v54 = vunpack.i.l.bf16 %v6004_v35 }
 0x735   : > { %v5423_v8 = vsel %vm5422_vm6, %v5420_v51, %v6000_v45  ;;  %v5424_v1 = vsel %vm5422_vm6, %v5421_v50, %v6001_v12 }
 0x736   : > { %v5426_v36 = vsel %vm5425_vm7, %v5423_v8, %v6005_v54  ;;  %v5427_v41 = vsel %vm5425_vm7, %v5424_v1, %v6006_v11 }
 0x737   : > { %v5428_v62 = vpack.c.bf16 %v5427_v41, %v5426_v36 }
 0x739   : > { %5903 = vmatmul.mubr.bf16.vlgmr.msra.gmra.mrb[28].mxu0 %v5428_v62 }
 0x80c   : > { %v5534_v0 = vpop.f32.mrb[28].mxu0 }
 0x80d   : > { %v5535_v32 = vadd.f32 %v5704_v56, %v5534_v0  ;;  %v5904_v59 = vpop.f32.mrb[29].mxu0 }
 0x80e   : > { %v5537_v15 = vpop.f32.mrb[30].mxu0 }
 0x80f   : > { %5541 = vst [vmem:[%s205_s20] sm:$0xff] %v5535_v32  ;;  %v5538_v58 = vadd.f32 %v5704_v56, %v5537_v15  ;;  %v5905_v3 = vpop.f32.mrb[31].mxu0 }
 0x811   : > { %5542 = vst [vmem:[%s205_s20 + $0x8] sm:$0xff] %v5538_v58 }
 0x812   : > { %6152 = shalt.err (!%p6149_p7)
}
 0x813   : > { %s6153_s9 = scalar_lea.hbm %s7427_s29, 256  ;;  %s6157_s5 = scalar_lea.hbm %s7474_s4, 512 }
 0x814   : > { %p6154_p8 = scmp.ne.s32.totalorder %s7427_s29, %s6153_s9  ;;  %p6158_p1 = scmp.lt.u32.totalorder %s7427_s29, %s7474_s4 }
 0x815   : > { %p6159_p0 = scmp.lt.u32.totalorder %s6157_s5, %s6153_s9  ;;  %p6161_p6 = scmp.lt.u32.totalorder %s6153_s9, %s7427_s29 }
 0x816   : > { %p6155_p11 = pnand %p6154_p8, %p7485_p9 }
 0x817   : > { %p6160_p5 = por %p6159_p0, %p6158_p1 }
 0x818   : > { %p6156_p13 = pneg %p6155_p11 }
 0x819   : > { %p6162_p10 = por %p6161_p6, %p6160_p5 }
 0x81b   : > { %p6163_p12 = pnand %p6162_p10, %p6156_p13 }
 0x81d   : > { %6166 = shalt.err (!%p6163_p12)
}
 0x81e   : > { %s6223_s8 = smov 128   ;;  %s6224_s20 = smov 8  }
 0x81f   : > { %5910 = dma.vmem_to_hbm [thread:$0]  (%p7485_p9), %s7422_s22, 256, %s7427_s29, %s7429_s30, %s6223_s8, %s6223_s8, %s6224_s20  }
 0x820 PF: > { %p5922_p2 = scmp.ge.s32.totalorder %s6205_s18, 2  ;;  %s5572_s23 = sand.u32 1, %s6193_s15  }
 0x821   : > { %p7486_p3 = scmp.ne.s32.totalorder %s7479_s26, 0  ;;  %s5573_s27 = scalar_lea.sflag [#allocation4], %s5572_s23 }
 0x823   : > { %p5917_p4 = pnand %p5922_p2, %p7486_p3 }
 0x825   : > { %6188 = dma.done.wait (!%p5917_p4), %s5573_s27, 256  }
 0x826   : > { %6190 = vsyncadd (!%p5917_p4), %s5573_s27, 4294967040  ;;  %p15_p7 = scmp.ge.s32.totalorder %s6275_s21, 4   ;;  %s7487_s15 = smov %s6197_s16 }
 0x827   : > { %s7488_s16 = smov %s6201_s17  ;;  %s7489_s17 = smov %s6286_s24 }
 0x828   : > { %s7490_s18 = smov %s6275_s21  ;;  %17 = sbr.rel (!%p15_p7) target bundleno = 4 (0x4), region = 76 }
 0x82f   :  { %5578 = vsyncpa [#allocation3], 1 }
 0x830   :  { %5580 = vsyncpa [#allocation3 + $0x1], 1 }
 0x831   :  { %5581 = vsyncpa [#allocation4], 1 }
 0x832   :  { %5583 = vsyncpa [#allocation4 + $0x1], 1 }

</bundles_post_ra>
